<compile_context>
chip_gen: v7x
topology: tpu7x:2x2x1
jax: 0.10.0
libtpu: 0.0.40
codegen_flags: <defaults>
</compile_context>

<pallas_src>
import functools

import jax
import jax.numpy as jnp
from jax import lax
from jax.experimental import pallas as pl
from jax.experimental.pallas import tpu as pltpu


def _round_up(x: int, m: int) -> int:
    return (x + m - 1) // m * m


# -----------------------------------------------------------------------------
# Pallas kernel: fused im2col conv3x3 + bias + ReLU, single matmul per tile
# -----------------------------------------------------------------------------
def _fused_conv3x3_kernel(x_ref, w_ref, b_ref, o_ref, lhs_ref, *, K, TR, W, Cin):
    # x_ref:   (1, H+2, W+2, Cin) bf16  whole padded image (resident per batch:
    #          index_map is constant along the row-tile axis -> one DMA / batch)
    # w_ref:   (K*K*Cin, CoutP)   bf16  folded-tap weight matrix, lane-dense N
    # b_ref:   (1, CoutP)         f32   bias (zero-padded lanes)
    # o_ref:   (1, TR*W, CoutP)   bf16  lane-dense output tile
    # lhs_ref: (TR*W, K*K*Cin)    bf16  VMEM scratch for the im2col tile
    tm = TR * W
    r0 = pl.program_id(1) * TR
    if TR % 8 == 0:
        r0 = pl.multiple_of(r0, 8)

    # Assemble the (TM, K*K*Cin) im2col tile from the VMEM-resident padded
    # image (fused im2col: no HBM patch matrix, 9x read blow-up avoided).
    # Column order (kh, kw, cin) matches w_hwio.reshape(K*K*Cin, Cout).
    for kh in range(K):
        for kw in range(K):
            tap = x_ref[0, pl.ds(r0 + kh, TR), pl.ds(kw, W), :]     # (TR, W, Cin)
            c0 = (kh * K + kw) * Cin
            lhs_ref[:, c0:c0 + Cin] = tap.reshape(tm, Cin)

    # ONE MXU matmul with contraction depth K*K*Cin: internal accumulation,
    # single result pop, no per-tap (TM, CoutP) f32 read-modify-write.
    acc = jnp.dot(lhs_ref[...], w_ref[...],
                  preferred_element_type=jnp.float32)               # (TM, CoutP) f32
    acc = acc + b_ref[...]                                          # bias broadcast
    o_ref[0] = jnp.maximum(acc, 0.0).astype(o_ref.dtype)            # ReLU, bf16 store


def fused_conv3x3_relu(x_nhwc, w_mat, bias_pad, cout, *, target_tm=128):
    """x_nhwc: (B,H,W,Cin) f32; w_mat: (K*K*Cin,CoutP) bf16; bias: (1,CoutP) f32."""
    B, H, W, Cin = x_nhwc.shape
    KKCin, CoutP = w_mat.shape
    K = 3
    assert KKCin == K * K * Cin

    # Row tile: largest divisor of H with TM = TR*W <= target_tm and TM % 8 == 0
    # (keeps the f32 matmul result tile at <=16 vregs for CoutP=128).  Fallback
    # TR = H means the block equals the full dim, so no divisibility issues and
    # no H padding / wasted rows in any case.
    TR = H
    for tr in range(1, H + 1):
        if H % tr == 0 and (tr * W) % 8 == 0 and tr * W <= target_tm:
            TR = tr
    nrt = H // TR
    TM = TR * W

    # SAME zero halo + single f32->bf16 cast; pad+cast fuse into one XLA pass.
    xp = jnp.pad(x_nhwc, ((0, 0), (1, 1), (1, 1), (0, 0))).astype(jnp.bfloat16)
    Hpp, Wp = H + 2, W + 2

    kernel = functools.partial(_fused_conv3x3_kernel, K=K, TR=TR, W=W, Cin=Cin)

    flops = 2 * B * H * W * KKCin * cout                 # true (unpadded) FLOPs
    bytes_accessed = int(xp.size * 2 + w_mat.size * 2 + bias_pad.size * 4
                         + B * H * W * CoutP * 2)

    out = pl.pallas_call(
        kernel,
        out_shape=jax.ShapeDtypeStruct((B, H * W, CoutP), jnp.bfloat16),
        grid=(B, nrt),
        in_specs=[
            # Whole padded image of batch b, constant across the row-tile axis
            # -> fetched once per batch element, no re-DMA per row tile.
            # TODO(synk): for large backbone images (esp. v7x 64 MiB VMEM) swap
            # this for halo row-slabs via memory_space=pl.ANY + make_async_copy.
            pl.BlockSpec((1, Hpp, Wp, Cin), lambda b, r: (b, 0, 0, 0)),
            pl.BlockSpec((KKCin, CoutP), lambda b, r: (0, 0)),
            pl.BlockSpec((1, CoutP), lambda b, r: (0, 0)),
        ],
        out_specs=pl.BlockSpec((1, TM, CoutP), lambda b, r: (b, r, 0)),
        scratch_shapes=[pltpu.VMEM((TM, KKCin), jnp.bfloat16)],
        compiler_params=pltpu.CompilerParams(
            dimension_semantics=("parallel", "parallel"),
            vmem_limit_bytes=32 * 1024 * 1024,
        ),
        cost_estimate=pl.CostEstimate(
            flops=flops, transcendentals=0, bytes_accessed=bytes_accessed),
    )(xp, w_mat, bias_pad)

    return out.reshape(B, H, W, CoutP)


# -----------------------------------------------------------------------------
# Wrapper mirroring GenericONNXModel.forward: returns {variant_name: features}
# -----------------------------------------------------------------------------
class GenericONNXModelPallas:
    """Synthetic stand-in for GenericONNXModel with one trimmed variant.

    The single registered (non-original) variant is named "features" and
    computes Conv2d(Cin, Cout, 3, stride=1, padding=SAME) + bias + ReLU,
    returned NHWC float32 to match the onnxruntime `[_, h, w, d]` convention.
    """

    def __init__(self, cin: int, cout: int, key=None):
        if key is None:
            key = jax.random.PRNGKey(0)
        kw_key, kb_key = jax.random.split(key)
        self.K = 3
        self.cin = cin
        self.cout = cout
        # Lane-dense output width.  TODO(synk): for cout >= 256 on v6e/v7x,
        # add an N grid axis tiled at 256 (native 256-wide MXU columns).
        self.cout_p = _round_up(cout, 128)

        # Torch conv weight layout: (Cout, Cin, Kh, Kw), deterministic init.
        w_torch = (
            jax.random.normal(kw_key, (cout, cin, self.K, self.K), jnp.float32)
            * (1.0 / (cin * self.K * self.K) ** 0.5)
        )
        self.bias = jax.random.normal(kb_key, (cout,), jnp.float32) * 0.1

        # HWIO for the pure-JAX reference; folded (K*K*Cin, CoutP) bf16 matrix
        # for the kernel, Cout zero-padded to a multiple of 128.
        w_hwio = jnp.transpose(w_torch, (2, 3, 1, 0))            # (K,K,Cin,Cout)
        w_mat = w_hwio.reshape(self.K * self.K * cin, cout)      # (kh,kw,cin) order
        self.w_mat = jnp.pad(
            w_mat, ((0, 0), (0, self.cout_p - cout))
        ).astype(jnp.bfloat16)
        self.bias_pad = jnp.pad(self.bias, (0, self.cout_p - cout)).reshape(
            1, self.cout_p
        )
        self.w_hwio_bf16 = w_hwio.astype(jnp.bfloat16)

    def forward(self, x_nchw):
        """x_nchw: (B, Cin, H, W) float32 -> dict[str, (B, H, W, Cout) float32]."""
        B, C, H, W = x_nchw.shape
        assert C == self.cin
        # TODO(synk): NCHW->NHWC layout glue for the synthetic backbone; a real
        # ONNX graph would carry its own layout handling.
        x_nhwc = jnp.transpose(x_nchw, (0, 2, 3, 1))
        y = fused_conv3x3_relu(x_nhwc, self.w_mat, self.bias_pad, self.cout)
        # Single fused slice+cast back to the float32 [_, h, w, d] convention.
        return {"features": y[..., : self.cout].astype(jnp.float32)}

    def reference(self, x_nchw):
        """Pure-JAX reference (bf16 inputs, f32 accumulate, bf16 writeback)."""
        x_nhwc = jnp.transpose(x_nchw, (0, 2, 3, 1)).astype(jnp.bfloat16)
        y = lax.conv_general_dilated(
            x_nhwc,
            self.w_hwio_bf16,
            window_strides=(1, 1),
            padding="SAME",
            dimension_numbers=("NHWC", "HWIO", "NHWC"),
            preferred_element_type=jnp.float32,
        )
        y = jnp.maximum(y + self.bias, 0.0)
        return y.astype(jnp.bfloat16).astype(jnp.float32)   # mirror bf16 store


if __name__ == "__main__":
    # Small shapes consistent with a conv backbone: NCHW input (2, 4, 16, 16).
    B, Cin, H, W = 2, 4, 16, 16
    Cout = 32

    key = jax.random.PRNGKey(0)
    x_key, p_key = jax.random.split(key)
    x = jax.random.normal(x_key, (B, Cin, H, W), jnp.float32)

    model = GenericONNXModelPallas(cin=Cin, cout=Cout, key=p_key)

    # TODO(synk): the original module loads/trims arbitrary user ONNX graphs and
    # runs them with onnxruntime; dynamic ONNX graph execution has no Pallas
    # equivalent, so a fixed conv+bias+ReLU trimmed-variant backbone is used.

    outputs = model.forward(x)
    feats = jax.block_until_ready(outputs["features"])

    ref = jax.block_until_ready(model.reference(x))
    assert feats.shape == (B, H, W, Cout)
    assert feats.dtype == jnp.float32
    max_err = float(jnp.max(jnp.abs(feats - ref)))
    assert jnp.allclose(feats, ref, atol=2e-2, rtol=2e-2), max_err

    print("KERNEL_OK")
</pallas_src>

<mosaic_0001>
module attributes {stable_mosaic.version = 11 : i64} {
  func.func @_fused_conv3x3_kernel(%arg0: i32, %arg1: i32, %arg2: memref<1x18x18x4xbf16, #tpu.memory_space<vmem>>, %arg3: memref<36x128xbf16, #tpu.memory_space<vmem>>, %arg4: memref<1x128xf32, #tpu.memory_space<vmem>>, %arg5: memref<1x128x128xbf16, #tpu.memory_space<vmem>>, %arg6: memref<128x36xbf16, #tpu.memory_space<vmem>>) attributes {dimension_semantics = [#tpu.dimension_semantics<parallel>, #tpu.dimension_semantics<parallel>], iteration_bounds = array<i64: 2, 2>, scalar_prefetch = 0 : i64, scratch_operands = 1 : i64, tpu.core_type = #tpu.core_type<tc>, window_params = [{transform_indices = @transform_0, window_bounds = array<i64: 1, 18, 18, 4>}, {pipeline_mode = #tpu.pipeline_mode<synchronous>, transform_indices = @transform_1, window_bounds = array<i64: 36, 128>}, {pipeline_mode = #tpu.pipeline_mode<synchronous>, transform_indices = @transform_2, window_bounds = array<i64: 1, 128>}, {transform_indices = @transform_3, window_bounds = array<i64: 1, 128, 128>}]} {
    %c8_i32 = arith.constant 8 : i32
    %0 = arith.muli %arg1, %c8_i32 : i32
    %1 = tpu.assume_multiple %0, 8 : i32
    %c0_i32 = arith.constant 0 : i32
    %2 = arith.addi %1, %c0_i32 : i32
    %c0 = arith.constant 0 : index
    %3 = arith.index_cast %2 : i32 to index
    %c0_0 = arith.constant 0 : index
    %c0_1 = arith.constant 0 : index
    %4 = vector.load %arg2[%c0, %3, %c0_0, %c0_1] : memref<1x18x18x4xbf16, #tpu.memory_space<vmem>>, vector<1x8x16x4xbf16>
    %5 = vector.shape_cast %4 : vector<1x8x16x4xbf16> to vector<8x16x4xbf16>
    %6 = vector.shape_cast %5 : vector<8x16x4xbf16> to vector<128x4xbf16>
    %c0_2 = arith.constant 0 : index
    %c0_3 = arith.constant 0 : index
    %7 = vector.load %arg6[%c0_2, %c0_3] : memref<128x36xbf16, #tpu.memory_space<vmem>>, vector<128x4xbf16>
    tpu.vector_store %arg6[%c0_2, %c0_3], %6 {strides = array<i32>} : memref<128x36xbf16, #tpu.memory_space<vmem>>, vector<128x4xbf16>,
    %c0_i32_4 = arith.constant 0 : i32
    %8 = arith.addi %1, %c0_i32_4 : i32
    %c0_5 = arith.constant 0 : index
    %9 = arith.index_cast %8 : i32 to index
    %c1 = arith.constant 1 : index
    %c0_6 = arith.constant 0 : index
    %10 = vector.load %arg2[%c0_5, %9, %c1, %c0_6] : memref<1x18x18x4xbf16, #tpu.memory_space<vmem>>, vector<1x8x16x4xbf16>
    %11 = vector.shape_cast %10 : vector<1x8x16x4xbf16> to vector<8x16x4xbf16>
    %12 = vector.shape_cast %11 : vector<8x16x4xbf16> to vector<128x4xbf16>
    %c0_7 = arith.constant 0 : index
    %c4 = arith.constant 4 : index
    %13 = vector.load %arg6[%c0_7, %c4] : memref<128x36xbf16, #tpu.memory_space<vmem>>, vector<128x4xbf16>
    tpu.vector_store %arg6[%c0_7, %c4], %12 {strides = array<i32>} : memref<128x36xbf16, #tpu.memory_space<vmem>>, vector<128x4xbf16>,
    %c0_i32_8 = arith.constant 0 : i32
    %14 = arith.addi %1, %c0_i32_8 : i32
    %c0_9 = arith.constant 0 : index
    %15 = arith.index_cast %14 : i32 to index
    %c2 = arith.constant 2 : index
    %c0_10 = arith.constant 0 : index
    %16 = vector.load %arg2[%c0_9, %15, %c2, %c0_10] : memref<1x18x18x4xbf16, #tpu.memory_space<vmem>>, vector<1x8x16x4xbf16>
    %17 = vector.shape_cast %16 : vector<1x8x16x4xbf16> to vector<8x16x4xbf16>
    %18 = vector.shape_cast %17 : vector<8x16x4xbf16> to vector<128x4xbf16>
    %c0_11 = arith.constant 0 : index
    %c8 = arith.constant 8 : index
    %19 = vector.load %arg6[%c0_11, %c8] : memref<128x36xbf16, #tpu.memory_space<vmem>>, vector<128x4xbf16>
    tpu.vector_store %arg6[%c0_11, %c8], %18 {strides = array<i32>} : memref<128x36xbf16, #tpu.memory_space<vmem>>, vector<128x4xbf16>,
    %c1_i32 = arith.constant 1 : i32
    %20 = arith.addi %1, %c1_i32 : i32
    %c0_12 = arith.constant 0 : index
    %21 = arith.index_cast %20 : i32 to index
    %c0_13 = arith.constant 0 : index
    %c0_14 = arith.constant 0 : index
    %22 = vector.load %arg2[%c0_12, %21, %c0_13, %c0_14] : memref<1x18x18x4xbf16, #tpu.memory_space<vmem>>, vector<1x8x16x4xbf16>
    %23 = vector.shape_cast %22 : vector<1x8x16x4xbf16> to vector<8x16x4xbf16>
    %24 = vector.shape_cast %23 : vector<8x16x4xbf16> to vector<128x4xbf16>
    %c0_15 = arith.constant 0 : index
    %c12 = arith.constant 12 : index
    %25 = vector.load %arg6[%c0_15, %c12] : memref<128x36xbf16, #tpu.memory_space<vmem>>, vector<128x4xbf16>
    tpu.vector_store %arg6[%c0_15, %c12], %24 {strides = array<i32>} : memref<128x36xbf16, #tpu.memory_space<vmem>>, vector<128x4xbf16>,
    %c1_i32_16 = arith.constant 1 : i32
    %26 = arith.addi %1, %c1_i32_16 : i32
    %c0_17 = arith.constant 0 : index
    %27 = arith.index_cast %26 : i32 to index
    %c1_18 = arith.constant 1 : index
    %c0_19 = arith.constant 0 : index
    %28 = vector.load %arg2[%c0_17, %27, %c1_18, %c0_19] : memref<1x18x18x4xbf16, #tpu.memory_space<vmem>>, vector<1x8x16x4xbf16>
    %29 = vector.shape_cast %28 : vector<1x8x16x4xbf16> to vector<8x16x4xbf16>
    %30 = vector.shape_cast %29 : vector<8x16x4xbf16> to vector<128x4xbf16>
    %c0_20 = arith.constant 0 : index
    %c16 = arith.constant 16 : index
    %31 = vector.load %arg6[%c0_20, %c16] : memref<128x36xbf16, #tpu.memory_space<vmem>>, vector<128x4xbf16>
    tpu.vector_store %arg6[%c0_20, %c16], %30 {strides = array<i32>} : memref<128x36xbf16, #tpu.memory_space<vmem>>, vector<128x4xbf16>,
    %c1_i32_21 = arith.constant 1 : i32
    %32 = arith.addi %1, %c1_i32_21 : i32
    %c0_22 = arith.constant 0 : index
    %33 = arith.index_cast %32 : i32 to index
    %c2_23 = arith.constant 2 : index
    %c0_24 = arith.constant 0 : index
    %34 = vector.load %arg2[%c0_22, %33, %c2_23, %c0_24] : memref<1x18x18x4xbf16, #tpu.memory_space<vmem>>, vector<1x8x16x4xbf16>
    %35 = vector.shape_cast %34 : vector<1x8x16x4xbf16> to vector<8x16x4xbf16>
    %36 = vector.shape_cast %35 : vector<8x16x4xbf16> to vector<128x4xbf16>
    %c0_25 = arith.constant 0 : index
    %c20 = arith.constant 20 : index
    %37 = vector.load %arg6[%c0_25, %c20] : memref<128x36xbf16, #tpu.memory_space<vmem>>, vector<128x4xbf16>
    tpu.vector_store %arg6[%c0_25, %c20], %36 {strides = array<i32>} : memref<128x36xbf16, #tpu.memory_space<vmem>>, vector<128x4xbf16>,
    %c2_i32 = arith.constant 2 : i32
    %38 = arith.addi %1, %c2_i32 : i32
    %c0_26 = arith.constant 0 : index
    %39 = arith.index_cast %38 : i32 to index
    %c0_27 = arith.constant 0 : index
    %c0_28 = arith.constant 0 : index
    %40 = vector.load %arg2[%c0_26, %39, %c0_27, %c0_28] : memref<1x18x18x4xbf16, #tpu.memory_space<vmem>>, vector<1x8x16x4xbf16>
    %41 = vector.shape_cast %40 : vector<1x8x16x4xbf16> to vector<8x16x4xbf16>
    %42 = vector.shape_cast %41 : vector<8x16x4xbf16> to vector<128x4xbf16>
    %c0_29 = arith.constant 0 : index
    %c24 = arith.constant 24 : index
    %43 = vector.load %arg6[%c0_29, %c24] : memref<128x36xbf16, #tpu.memory_space<vmem>>, vector<128x4xbf16>
    tpu.vector_store %arg6[%c0_29, %c24], %42 {strides = array<i32>} : memref<128x36xbf16, #tpu.memory_space<vmem>>, vector<128x4xbf16>,
    %c2_i32_30 = arith.constant 2 : i32
    %44 = arith.addi %1, %c2_i32_30 : i32
    %c0_31 = arith.constant 0 : index
    %45 = arith.index_cast %44 : i32 to index
    %c1_32 = arith.constant 1 : index
    %c0_33 = arith.constant 0 : index
    %46 = vector.load %arg2[%c0_31, %45, %c1_32, %c0_33] : memref<1x18x18x4xbf16, #tpu.memory_space<vmem>>, vector<1x8x16x4xbf16>
    %47 = vector.shape_cast %46 : vector<1x8x16x4xbf16> to vector<8x16x4xbf16>
    %48 = vector.shape_cast %47 : vector<8x16x4xbf16> to vector<128x4xbf16>
    %c0_34 = arith.constant 0 : index
    %c28 = arith.constant 28 : index
    %49 = vector.load %arg6[%c0_34, %c28] : memref<128x36xbf16, #tpu.memory_space<vmem>>, vector<128x4xbf16>
    tpu.vector_store %arg6[%c0_34, %c28], %48 {strides = array<i32>} : memref<128x36xbf16, #tpu.memory_space<vmem>>, vector<128x4xbf16>,
    %c2_i32_35 = arith.constant 2 : i32
    %50 = arith.addi %1, %c2_i32_35 : i32
    %c0_36 = arith.constant 0 : index
    %51 = arith.index_cast %50 : i32 to index
    %c2_37 = arith.constant 2 : index
    %c0_38 = arith.constant 0 : index
    %52 = vector.load %arg2[%c0_36, %51, %c2_37, %c0_38] : memref<1x18x18x4xbf16, #tpu.memory_space<vmem>>, vector<1x8x16x4xbf16>
    %53 = vector.shape_cast %52 : vector<1x8x16x4xbf16> to vector<8x16x4xbf16>
    %54 = vector.shape_cast %53 : vector<8x16x4xbf16> to vector<128x4xbf16>
    %c0_39 = arith.constant 0 : index
    %c32 = arith.constant 32 : index
    %55 = vector.load %arg6[%c0_39, %c32] : memref<128x36xbf16, #tpu.memory_space<vmem>>, vector<128x4xbf16>
    tpu.vector_store %arg6[%c0_39, %c32], %54 {strides = array<i32>} : memref<128x36xbf16, #tpu.memory_space<vmem>>, vector<128x4xbf16>,
    %c0_40 = arith.constant 0 : index
    %c0_41 = arith.constant 0 : index
    %56 = vector.load %arg6[%c0_40, %c0_41] : memref<128x36xbf16, #tpu.memory_space<vmem>>, vector<128x36xbf16>
    %c0_42 = arith.constant 0 : index
    %c0_43 = arith.constant 0 : index
    %57 = vector.load %arg3[%c0_42, %c0_43] : memref<36x128xbf16, #tpu.memory_space<vmem>>, vector<36x128xbf16>
    %cst = arith.constant dense<0.000000e+00> : vector<128x128xf32>
    %58 = tpu.matmul %56, %57, %cst {dimension_numbers = #tpu.dot_dimension_numbers<[1], [0], [0], [1], [0, 0, 1, 1], [], []>} : vector<128x36xbf16>, vector<36x128xbf16>, vector<128x128xf32> -> vector<128x128xf32>
    %c0_44 = arith.constant 0 : index
    %c0_45 = arith.constant 0 : index
    %59 = vector.load %arg4[%c0_44, %c0_45] : memref<1x128xf32, #tpu.memory_space<vmem>>, vector<1x128xf32>
    %60 = vector.broadcast %59 : vector<1x128xf32> to vector<128x128xf32>
    %61 = arith.addf %58, %60 : vector<128x128xf32>
    %cst_46 = arith.constant 0.000000e+00 : f32
    %62 = vector.broadcast %cst_46 : f32 to vector<128x128xf32>
    %63 = arith.maximumf %61, %62 : vector<128x128xf32>
    %64 = arith.truncf %63 : vector<128x128xf32> to vector<128x128xbf16>
    %c0_47 = arith.constant 0 : index
    %c0_48 = arith.constant 0 : index
    %c0_49 = arith.constant 0 : index
    %65 = vector.load %arg5[%c0_47, %c0_48, %c0_49] : memref<1x128x128xbf16, #tpu.memory_space<vmem>>, vector<1x128x128xbf16>
    %66 = vector.shape_cast %65 : vector<1x128x128xbf16> to vector<128x128xbf16>
    %67 = vector.shape_cast %64 : vector<128x128xbf16> to vector<1x128x128xbf16>
    tpu.vector_store %arg5[%c0_47, %c0_48, %c0_49], %67 {strides = array<i32>} : memref<1x128x128xbf16, #tpu.memory_space<vmem>>, vector<1x128x128xbf16>,
    return
  }
  func.func @transform_0(%arg0: i32, %arg1: i32) -> (i32, i32, i32, i32) {
    %c0_i32 = arith.constant 0 : i32
    %c0_i32_0 = arith.constant 0 : i32
    %c0_i32_1 = arith.constant 0 : i32
    %c0_i32_2 = arith.constant 0 : i32
    return %arg0, %c0_i32, %c0_i32_0, %c0_i32_1 : i32, i32, i32, i32
  }
  func.func @transform_1(%arg0: i32, %arg1: i32) -> (i32, i32) {
    %c0_i32 = arith.constant 0 : i32
    %c0_i32_0 = arith.constant 0 : i32
    %c0_i32_1 = arith.constant 0 : i32
    return %c0_i32, %c0_i32_0 : i32, i32
  }
  func.func @transform_2(%arg0: i32, %arg1: i32) -> (i32, i32) {
    %c0_i32 = arith.constant 0 : i32
    %c0_i32_0 = arith.constant 0 : i32
    %c0_i32_1 = arith.constant 0 : i32
    return %c0_i32, %c0_i32_0 : i32, i32
  }
  func.func @transform_3(%arg0: i32, %arg1: i32) -> (i32, i32, i32) {
    %c0_i32 = arith.constant 0 : i32
    %c0_i32_0 = arith.constant 0 : i32
    return %arg0, %arg1, %c0_i32 : i32, i32, i32
  }
}

</mosaic_0001>

<bundles_post_ra>
// kernel: tpu_custom_call.1
= control target key start
LH: loop header
LB: loop body
LE: loop exit
PB: predicated region body
PF: predicated region fallthrough
CT: control target
= control target key end

     0   :  { %8 = vsyncpa [#allocation4], 0  ;;  %s3428_s0 = inlined_call_operand.vmem [shape: bf16[2,18,18,4], index: 0, kind: input, shape index: {}]   ;;  %s3429_s1 = inlined_call_operand.vmem [shape: bf16[36,128], index: 1, kind: input, shape index: {}]   ;;  %s3430_s2 = inlined_call_operand.vmem [shape: f32[1,128], index: 2, kind: input, shape index: {}]   ;;  %s3431_s3 = inlined_call_operand.hbm [shape: bf16[2,256,128], index: 3, kind: output, shape index: {}]  }
   0x1   :  { %10 = vsyncpa [#allocation4 + $0x1], 0  ;;  %s2726_s12 = smov 0   ;;  %s2728_s13 = smov 0  }
   0x2   :  { %s2730_s14 = smov 0   ;;  %s2732_s15 = smov 0  }
   0x3   :  { %s2734_s16 = smov 0   ;;  %s2736_s17 = smov 0  }
   0x4   :  { %s2738_s18 = smov 0   ;;  %s2740_s19 = smov 0  }
   0x5 LB: > { %s2115_s20 = sadd.s32 4294967295, %s2694_s19   ;;  %s2116_s21 = sadd.s32 4294967294, %s2694_s19   ;;  %s2694_s19 = sphi %s2740_s19, %s16_s19   ;;  %s2690_s18 = sphi %s2738_s18, %s3444_s18   ;;  %s2686_s17 = sphi %s2736_s17, %s3443_s17   ;;  %s2682_s16 = sphi %s2734_s16, %s3442_s16   ;;  %s2678_s15 = sphi %s2732_s15, %s3441_s15   ;;  %s2674_s14 = sphi %s2730_s14, %s3440_s14   ;;  %s2670_s13 = sphi %s2728_s13, %s3439_s13   ;;  %s2666_s12 = sphi %s2726_s12, %s3438_s12  }
   0x6   : > { %s25_s22 = sadd.s32 1, %s2686_s17  ;;  %s28_s23 = sadd.s32 1, %s2690_s18 }
   0x7   : > { %p26_p0 = scmp.ge.s32.totalorder %s25_s22, 2  ;;  %p115_p1 = scmp.ne.s32.totalorder %s2674_s14, %s2670_s13 }
   0x8   : > { %p116_p2 = scmp.eq.s32.totalorder %s2115_s20, 3  ;;  %p121_p5 = scmp.ne.s32.totalorder %s2670_s13, %s2666_s12 }
   0x9   : > { %s3446_s22 = smov (%p26_p0, %s25_s22), 0  ;;  %s3448_s23 = smov (!%p26_p0, %s28_s23), %s2690_s18 }
   0xa   : > { %s101_s24 = ssub.s32 %s2686_s17, %s3446_s22  ;;  %p2777_p3 = por %p116_p2, %p115_p1 }
   0xb   : > { %p30_p4 = scmp.ge.s32.totalorder %s3448_s23, 2  ;;  %p122_p6 = scmp.eq.s32.totalorder %s2116_s21, 3 }
   0xc   : > { %p2119_p7 = scmp.ge.s32.totalorder %s2694_s19, 1  ;;  %p154_p9 = scmp.lt.s32.totalorder %s2694_s19, 5 }
   0xd   : > { %s3450_s23 = smov (%p30_p4, %s3448_s23), 0  ;;  %p2786_p8 = por %p122_p6, %p121_p5 }
   0xe   : > { %s100_s27 = ssub.s32 %s2690_s18, %s3450_s23  ;;  %s105_s28 = sadd.s32 1, %s2674_s14 }
   0xf   : > { %s102_s29 = sor.u32 %s101_s24, %s100_s27  ;;  %p155_p10 = pnand %p2119_p7, %p154_p9 }
  0x10   : > { %p103_p11 = scmp.eq.s32.totalorder %s102_s29, 0  ;;  %p178_p12 = scmp.lt.s32.totalorder (!%p155_p10), %s2682_s16, 1  ;;  %vm586_vm0 = vcmask (!%p155_p10), 1042432   ;;  %vm587_vm1 = vcmask (!%p155_p10), 1046532   ;;  %vm286_vm3 = vsmask.f32 (!%p155_p10), 3328 }
  0x11   : > { %158 = sbr.rel (%p155_p10) target bundleno = 545 (0x221), region = 32  ;;  %vm2805_vm2 = vmor (!%p155_p10), %vm586_vm0, %vm587_vm1  ;;  %s2696_s11 = smov (!%p155_p10), 12   ;;  %vm287_vm4 = vsmask.f32 (!%p155_p10), 7440  ;;  %vm253_vm6 = vcmask (!%p155_p10), 31744   ;;  %vm529_vm7 = vcmask (!%p155_p10), 64544  }
  0x12   : > { %s2795_s30 = scalar_select %p103_p11, %s2674_s14, %s105_s28  }
  0x13   : > { %s2387_s5 = smul.u32 (!%p155_p10), 96, %s2678_s15  ;;  %s2697_s20 = smov (!%p155_p10), 8   ;;  %vm2859_vm5 = vmor (!%p155_p10), %vm286_vm3, %vm287_vm4  ;;  %vm693_vm8 = vcmask (!%p155_p10), 97344   ;;  %vm786_vm9 = vcmask (!%p155_p10), 130144   ;;  %vm1816_vm10 = vcmask (!%p155_p10), 1041408   ;;  %vm1059_vm11 = vcmask (!%p155_p10), 162944  }
  0x14   : > { %s2698_s21 = smov (!%p155_p10), 4   ;;  %s2699_s24 = smov (!%p155_p10), 16   ;;  %vm1220_vm12 = vcmask (!%p155_p10), 195744   ;;  %vm1313_vm13 = vcmask (!%p155_p10), 228544   ;;  %vm1586_vm14 = vcmask (!%p155_p10), 261344   ;;  %vm1747_vm15 = vcmask (!%p155_p10), 294144  }
  0x15   : > { %s2700_s27 = smov (!%p155_p10), 20   ;;  %s2701_s28 = smov (!%p155_p10), 24   ;;  %vm1791_vm0 = vcmask (!%p155_p10), 293888  }
  0x16   : > { %s2702_s29 = smov (!%p155_p10), 28  }
  0x18   : > { %s179_s4 = scalar_select %p178_p12, %s2682_s16, 1 }
  0x1a   : > { %s2492_s6 = smul.u32 216, %s179_s4  ;;  %s2383_s4 = sshll.u32 %s2682_s16, 5 }
  0x1c   : > { %s182_s9 = scalar_lea.vmem %s3428_s0, %s2492_s6  ;;  %s2703_s6 = smov 32  }
  0x1d   : > { %s2803_s10 = scalar_lea.vmem %s182_s9, %s2387_s5 }
  0x1e   : > { %v2573_v1 = vld [vmem:[%s2803_s10 + $0x3c] sm:$0xff]   ;;  %v2574_v2 = vld [vmem:[%s2803_s10 + $0xc] sm:$0xff]   ;;  %v551_v6 = vld [vmem:[%s2803_s10 + $0x34] sm:$0xf] }
  0x1f   : > { %770 = vrot.lane.b32.xlu1 %v2573_v1, %s2696_s11  ;;  %v2575_v3 = vld [vmem:[%s2803_s10 + $0x48] sm:$0xff]   ;;  %762 = vrot.lane.b32.xlu0 %v2574_v2, %s2696_s11  ;;  %v2576_v4 = vld [vmem:[%s2803_s10 + $0x18] sm:$0xff]   ;;  %v619_v9 = vrot.slane %v551_v6, 5 }
  0x20   : > { %v550_v5 = vld [vmem:[%s2803_s10 + $0x30] sm:$0xe]  ;;  %v552_v7 = vld [vmem:[%s2803_s10 + $0x38] sm:$0x1]  ;;  %v538_v11 = vld [vmem:[%s2803_s10] sm:$0xe] }
  0x21   : > { %v2145_v8 = vrot.slane %v550_v5, 9  ;;  %v622_v10 = vrot.slane %v552_v7, 5  ;;  %v539_v12 = vld [vmem:[%s2803_s10 + $0x4] sm:$0xf]  ;;  %v540_v13 = vld [vmem:[%s2803_s10 + $0x8] sm:$0x1] }
  0x22   : > { %v2141_v14 = vrot.slane %v538_v11, 9  ;;  %v621_v16 = vrot.slane %v619_v9, 4  ;;  %v591_v17 = vrot.slane %v539_v12, 5  ;;  %v594_v18 = vrot.slane %v540_v13, 5  ;;  %v553_v19 = vld [vmem:[%s2803_s10 + $0x3c] sm:$0xe] }
  0x23   : > { %772 = vrot.lane.b32.xlu1 %v2575_v3, %s2696_s11  ;;  %764 = vrot.lane.b32.xlu0 %v2576_v4, %s2696_s11  ;;  %v620_v15 = vsel %vm2805_vm2, %v2145_v8, %v619_v9  ;;  %v554_v20 = vld [vmem:[%s2803_s10 + $0x40] sm:$0xf]  ;;  %v555_v21 = vld [vmem:[%s2803_s10 + $0x44] sm:$0x1]  ;;  %v2146_v22 = vrot.slane %v553_v19, 9 }
  0x24   : > { %v623_v23 = vsel %vm2805_vm2, %v621_v16, %v622_v10  ;;  %v592_v24 = vsel %vm2805_vm2, %v2141_v14, %v591_v17  ;;  %v593_v25 = vrot.slane %v591_v17, 4  ;;  %v626_v26 = vrot.slane %v554_v20, 5  ;;  %v541_v27 = vld [vmem:[%s2803_s10 + $0xc] sm:$0xe]  ;;  %v542_v28 = vld [vmem:[%s2803_s10 + $0x10] sm:$0xf] }
  0x25   : > { %v2153_v29 = vcombine.low %v620_v15, %v623_v23  ;;  %v629_v30 = vrot.slane %v555_v21, 5  ;;  %v543_v31 = vld [vmem:[%s2803_s10 + $0x14] sm:$0x1]  ;;  %v2142_v32 = vrot.slane %v541_v27, 9  ;;  %v598_v33 = vrot.slane %v542_v28, 5 }
  0x26   : > { %v595_v34 = vsel %vm2805_vm2, %v593_v25, %v594_v18  ;;  %v627_v35 = vsel %vm2805_vm2, %v2146_v22, %v626_v26  ;;  %v628_v36 = vrot.slane %v626_v26, 4  ;;  %v601_v37 = vrot.slane %v543_v31, 5  ;;  %v265_v38 = vld [vmem:[%s2803_s10 + $0xc] sm:$0xf]  ;;  %v266_v39 = vld [vmem:[%s2803_s10 + $0x10] sm:$0xf] }
  0x27   : > { %677 = vrot.lane.b32.xlu1 %v2153_v29, %s2697_s20  ;;  %v2149_v40 = vcombine.low %v592_v24, %v595_v34  ;;  %v599_v41 = vsel %vm2805_vm2, %v2142_v32, %v598_v33  ;;  %v600_v42 = vrot.slane %v598_v33, 4  ;;  %v267_v43 = vld [vmem:[%s2803_s10 + $0x14] sm:$0x1]  ;;  %v314_v44 = vshrl.u32 %v265_v38, 16  ;;  %v262_v45 = vld [vmem:[%s2803_s10] sm:$0xf] }
  0x28   : > { %v630_v46 = vsel %vm2805_vm2, %v628_v36, %v629_v30  ;;  %v317_v47 = vshll.u32 %v265_v38, 16  ;;  %v323_v48 = vshll.u32 %v266_v39, 16  ;;  %v327_v49 = vshrl.u32 %v266_v39, 16  ;;  %v263_v50 = vld [vmem:[%s2803_s10 + $0x4] sm:$0xf] }
  0x29   : > { %669 = vrot.lane.b32.xlu0 %v2149_v40, %s2697_s20  ;;  %v2154_v51 = vcombine.low %v627_v35, %v630_v46  ;;  %v602_v52 = vsel %vm2805_vm2, %v600_v42, %v601_v37  ;;  %v316_v53 = vrot.slane %v314_v44, 4  ;;  %v333_v54 = vshll.u32 %v267_v43, 16  ;;  %v264_v55 = vld [vmem:[%s2803_s10 + $0x8] sm:$0x1]  ;;  %v277_v60 = vld [vmem:[%s2803_s10 + $0x3c] sm:$0xf] }
  0x2a   : > { %v2150_v56 = vcombine.low %v599_v41, %v602_v52  ;;  %v319_v57 = vrot.slane %v317_v47, 5  ;;  %v325_v58 = vrot.slane %v323_v48, 5  ;;  %v329_v59 = vrot.slane %v327_v49, 4  ;;  %v278_v6 = vld [vmem:[%s2803_s10 + $0x40] sm:$0xf] }
  0x2b   : > { %679 = vrot.lane.b32.xlu1 %v2154_v51, %s2697_s20  ;;  %v335_v61 = vrot.slane %v333_v54, 5  ;;  %v290_v62 = vshrl.u32 %v262_v45, 16  ;;  %v293_v63 = vshll.u32 %v262_v45, 16  ;;  %v299_v1 = vshll.u32 %v263_v50, 16  ;;  %v279_v16 = vld [vmem:[%s2803_s10 + $0x44] sm:$0x1] }
  0x2c   : > { %v320_v2 = vor.u32 %v319_v57, %v316_v53  ;;  %v330_v3 = vor.u32 %v329_v59, %v325_v58  ;;  %v303_v4 = vshrl.u32 %v263_v50, 16  ;;  %v309_v5 = vshll.u32 %v264_v55, 16  ;;  %v274_v21 = vld [vmem:[%s2803_s10 + $0x30] sm:$0xf]  ;;  %v275_v26 = vld [vmem:[%s2803_s10 + $0x34] sm:$0xf] }
  0x2d   : > { %671 = vrot.lane.b32.xlu0 %v2150_v56, %s2697_s20  ;;  %v292_v8 = vrot.slane %v290_v62, 4  ;;  %v295_v9 = vrot.slane %v293_v63, 5  ;;  %v301_v10 = vrot.slane %v299_v1, 5  ;;  %v410_v11 = vshrl.u32 %v277_v60, 16  ;;  %v276_v37 = vld [vmem:[%s2803_s10 + $0x38] sm:$0x1] }
  0x2e   : > { %v321_v12 = vrot.slane %v320_v2, 4  ;;  %v331_v13 = vrot.slane %v330_v3, 4  ;;  %v305_v14 = vrot.slane %v303_v4, 4  ;;  %v311_v15 = vrot.slane %v309_v5, 5  ;;  %v2195_v40 = vld [vmem:[%s2803_s10 + $0x3c] sm:$0xf] }
  0x2f   : > { %v296_v17 = vor.u32 %v295_v9, %v292_v8  ;;  %v412_v18 = vrot.slane %v410_v11, 4  ;;  %v413_v19 = vshll.u32 %v277_v60, 16  ;;  %v419_v20 = vshll.u32 %v278_v6, 16  ;;  %v2196_v45 = vld [vmem:[%s2803_s10 + $0x40] sm:$0xf] }
  0x30   : > { %v326_v22 = vsel %vm2859_vm5, %v321_v12, %v325_v58  ;;  %v336_v23 = vsel %vm2859_vm5, %v331_v13, %v335_v61  ;;  %v306_v24 = vor.u32 %v305_v14, %v301_v10  ;;  %v423_v25 = vshrl.u32 %v278_v6, 16  ;;  %v2197_v56 = vld [vmem:[%s2803_s10 + $0x44] sm:$0x1]  ;;  %v2183_v59 = vld [vmem:[%s2803_s10 + $0xc] sm:$0xf] }
  0x31   : > { %v2134_v27 = vcombine.low %v326_v22, %v336_v23  ;;  %v297_v28 = vrot.slane %v296_v17, 4  ;;  %v415_v29 = vrot.slane %v413_v19, 5  ;;  %v421_v30 = vrot.slane %v419_v20, 5  ;;  %v2184_v1 = vld [vmem:[%s2803_s10 + $0x10] sm:$0xf] }
  0x32   : > { %v307_v31 = vrot.slane %v306_v24, 4  ;;  %v425_v32 = vrot.slane %v423_v25, 4  ;;  %v429_v33 = vshll.u32 %v279_v16, 16  ;;  %v386_v34 = vshrl.u32 %v274_v21, 16  ;;  %v2185_v13 = vld [vmem:[%s2803_s10 + $0x14] sm:$0x1] }
  0x33   : > { %507 = vrot.lane.b32.xlu1 %v2134_v27, %s2698_s21  ;;  %v302_v35 = vsel %vm2859_vm5, %v297_v28, %v301_v10  ;;  %v416_v36 = vor.u32 %v415_v29, %v412_v18  ;;  %v389_v38 = vshll.u32 %v274_v21, 16  ;;  %v395_v39 = vshll.u32 %v275_v26, 16  ;;  %v2198_v16 = vld [vmem:[%s2803_s10 + $0x48] sm:$0xf]  ;;  %v2199_v28 = vld [vmem:[%s2803_s10 + $0x4c] sm:$0xf] }
  0x34   : > { %v312_v41 = vsel %vm2859_vm5, %v307_v31, %v311_v15  ;;  %v426_v42 = vor.u32 %v425_v32, %v421_v30  ;;  %v431_v43 = vrot.slane %v429_v33, 5  ;;  %v388_v44 = vrot.slane %v386_v34, 4  ;;  %v2200_v29 = vld [vmem:[%s2803_s10 + $0x50] sm:$0x1] }
  0x35   : > { %v2133_v46 = vcombine.low %v302_v35, %v312_v41  ;;  %v417_v47 = vrot.slane %v416_v36, 4  ;;  %v391_v48 = vrot.slane %v389_v38, 5  ;;  %v397_v49 = vrot.slane %v395_v39, 5  ;;  %v2186_v35 = vld [vmem:[%s2803_s10 + $0x18] sm:$0xf] }
  0x36   : > { %v427_v50 = vrot.slane %v426_v42, 4  ;;  %v399_v51 = vshrl.u32 %v275_v26, 16  ;;  %v405_v52 = vshll.u32 %v276_v37, 16  ;;  %v916_v53 = vshrl.u32 %v2195_v40, 16 }
  0x37   : > { %505 = vrot.lane.b32.xlu0 %v2133_v46, %s2698_s21  ;;  %v422_v54 = vsel %vm2859_vm5, %v417_v47, %v421_v30  ;;  %v392_v55 = vor.u32 %v391_v48, %v388_v44  ;;  %v919_v57 = vshll.u32 %v2195_v40, 16  ;;  %v925_v58 = vshll.u32 %v2196_v45, 16  ;;  %v2187_v40 = vld [vmem:[%s2803_s10 + $0x1c] sm:$0xf] }
  0x38   : > { %v432_v60 = vsel %vm2859_vm5, %v427_v50, %v431_v43  ;;  %v401_v61 = vrot.slane %v399_v51, 4  ;;  %v407_v62 = vrot.slane %v405_v52, 5  ;;  %v918_v63 = vrot.slane %v916_v53, 4  ;;  %v2227_v50 = vld [vmem:[%s2803_s10 + $0x3c] sm:$0xe] }
  0x39   : > { %v2138_v2 = vcombine.low %v422_v54, %v432_v60  ;;  %v393_v3 = vrot.slane %v392_v55, 4  ;;  %v921_v4 = vrot.slane %v919_v57, 5  ;;  %v927_v5 = vrot.slane %v925_v58, 5  ;;  %v2228_v55 = vld [vmem:[%s2803_s10 + $0x40] sm:$0xf] }
  0x3a   : > { %v402_v6 = vor.u32 %v401_v61, %v397_v49  ;;  %v929_v8 = vshrl.u32 %v2196_v45, 16  ;;  %v935_v9 = vshll.u32 %v2197_v56, 16  ;;  %v820_v10 = vshrl.u32 %v2183_v59, 16  ;;  %v2188_v45 = vld [vmem:[%s2803_s10 + $0x20] sm:$0x1] }
  0x3b   : > { %515 = vrot.lane.b32.xlu1 %v2138_v2, %s2698_s21  ;;  %v398_v11 = vsel %vm2859_vm5, %v393_v3, %v397_v49  ;;  %v922_v12 = vor.u32 %v921_v4, %v918_v63  ;;  %v823_v14 = vshll.u32 %v2183_v59, 16  ;;  %v829_v15 = vshll.u32 %v2184_v1, 16 }
  0x3c   : > { %v403_v17 = vrot.slane %v402_v6, 4  ;;  %v931_v18 = vrot.slane %v929_v8, 4  ;;  %v937_v19 = vrot.slane %v935_v9, 5  ;;  %v822_v20 = vrot.slane %v820_v10, 4  ;;  %v2215_v6 = vld [vmem:[%s2803_s10 + $0xc] sm:$0xe] }
  0x3d   : > { %v923_v21 = vrot.slane %v922_v12, 4  ;;  %v825_v22 = vrot.slane %v823_v14, 5  ;;  %v831_v23 = vrot.slane %v829_v15, 5  ;;  %v833_v24 = vshrl.u32 %v2184_v1, 16  ;;  %v2216_v12 = vld [vmem:[%s2803_s10 + $0x10] sm:$0xf] }
  0x3e   : > { %v408_v25 = vsel %vm2859_vm5, %v403_v17, %v407_v62  ;;  %v932_v26 = vor.u32 %v931_v18, %v927_v5  ;;  %v839_v27 = vshll.u32 %v2185_v13, 16  ;;  %v940_v30 = vshrl.u32 %v2198_v16, 16  ;;  %v2217_v17 = vld [vmem:[%s2803_s10 + $0x14] sm:$0x1] }
  0x3f   : > { %v2137_v31 = vcombine.low %v398_v11, %v408_v25  ;;  %v928_v32 = vsel %vm2859_vm5, %v923_v21, %v927_v5  ;;  %v826_v33 = vor.u32 %v825_v22, %v822_v20  ;;  %v835_v34 = vrot.slane %v833_v24, 4  ;;  %v2229_v5 = vld [vmem:[%s2803_s10 + $0x44] sm:$0x1]  ;;  %v2230_v22 = vld [vmem:[%s2803_s10 + $0x48] sm:$0xe] }
  0x40   : > { %v933_v36 = vrot.slane %v932_v26, 4  ;;  %v841_v37 = vrot.slane %v839_v27, 5  ;;  %v942_v38 = vrot.slane %v940_v30, 4  ;;  %v943_v39 = vshll.u32 %v2198_v16, 16  ;;  %v2231_v27 = vld [vmem:[%s2803_s10 + $0x4c] sm:$0xf] }
  0x41   : > { %513 = vrot.lane.b32.xlu0 %v2137_v31, %s2698_s21  ;;  %v827_v41 = vrot.slane %v826_v33, 4  ;;  %v836_v42 = vor.u32 %v835_v34, %v831_v23  ;;  %v949_v43 = vshll.u32 %v2199_v28, 16  ;;  %v953_v44 = vshrl.u32 %v2199_v28, 16  ;;  %v2232_v28 = vld [vmem:[%s2803_s10 + $0x50] sm:$0x1] }
  0x42   : > { %v938_v46 = vsel %vm2859_vm5, %v933_v36, %v937_v19  ;;  %v945_v47 = vrot.slane %v943_v39, 5  ;;  %v959_v48 = vshll.u32 %v2200_v29, 16  ;;  %v844_v49 = vshrl.u32 %v2186_v35, 16  ;;  %v2218_v33 = vld [vmem:[%s2803_s10 + $0x18] sm:$0xe] }
  0x43   : > { %v2211_v51 = vcombine.low %v928_v32, %v938_v46  ;;  %v832_v52 = vsel %vm2859_vm5, %v827_v41, %v831_v23  ;;  %v837_v53 = vrot.slane %v836_v42, 4  ;;  %v951_v54 = vrot.slane %v949_v43, 5  ;;  %v2220_v39 = vld [vmem:[%s2803_s10 + $0x20] sm:$0x1] }
  0x44   : > { %v946_v56 = vor.u32 %v945_v47, %v942_v38  ;;  %v955_v57 = vrot.slane %v953_v44, 4  ;;  %v961_v58 = vrot.slane %v959_v48, 5  ;;  %v846_v59 = vrot.slane %v844_v49, 4  ;;  %v2219_v38 = vld [vmem:[%s2803_s10 + $0x1c] sm:$0xf] }
  0x45   : > { %1043 = vrot.lane.b32.xlu1 %v2211_v51, %s2699_s24  ;;  %v842_v60 = vsel %vm2859_vm5, %v837_v53, %v841_v37  ;;  %v847_v61 = vshll.u32 %v2186_v35, 16  ;;  %v853_v62 = vshll.u32 %v2187_v40, 16  ;;  %v857_v63 = vshrl.u32 %v2187_v40, 16  ;;  %v2293_v44 = vld [vmem:[%s2803_s10 + $0x48] sm:$0xf] }
  0x46   : > { %v2207_v1 = vcombine.low %v832_v52, %v842_v60  ;;  %v947_v2 = vrot.slane %v946_v56, 4  ;;  %v956_v3 = vor.u32 %v955_v57, %v951_v54  ;;  %v863_v4 = vshll.u32 %v2188_v45, 16  ;;  %v2294_v45 = vld [vmem:[%s2803_s10 + $0x4c] sm:$0xf] }
  0x47   : > { %v849_v8 = vrot.slane %v847_v61, 5  ;;  %v855_v9 = vrot.slane %v853_v62, 5  ;;  %v859_v10 = vrot.slane %v857_v63, 4  ;;  %v2243_v11 = vrot.slane %v2227_v50, 9 }
  0x48   : > { %1035 = vrot.lane.b32.xlu0 %v2207_v1, %s2699_s24  ;;  %v952_v13 = vsel %vm2859_vm5, %v947_v2, %v951_v54  ;;  %v957_v14 = vrot.slane %v956_v3, 4  ;;  %v865_v15 = vrot.slane %v863_v4, 5  ;;  %v1146_v16 = vrot.slane %v2228_v55, 5  ;;  %v2295_v54 = vld [vmem:[%s2803_s10 + $0x50] sm:$0x1] }
  0x49   : > { %v850_v18 = vor.u32 %v849_v8, %v846_v59  ;;  %v860_v19 = vor.u32 %v859_v10, %v855_v9  ;;  %v1149_v20 = vrot.slane %v2229_v5, 5  ;;  %v2239_v21 = vrot.slane %v2215_v6, 9  ;;  %v2281_v59 = vld [vmem:[%s2803_s10 + $0x18] sm:$0xf]  ;;  %v2282_v1 = vld [vmem:[%s2803_s10 + $0x1c] sm:$0xf] }
  0x4a   : > { %v962_v23 = vsel %vm2859_vm5, %v957_v14, %v961_v58  ;;  %v1147_v24 = vsel %vm2805_vm2, %v2243_v11, %v1146_v16  ;;  %v1148_v25 = vrot.slane %v1146_v16, 4  ;;  %v1118_v26 = vrot.slane %v2216_v12, 5  ;;  %v2283_v10 = vld [vmem:[%s2803_s10 + $0x20] sm:$0x1]  ;;  %v2296_v16 = vld [vmem:[%s2803_s10 + $0x54] sm:$0xf] }
  0x4b   : > { %v2212_v29 = vcombine.low %v952_v13, %v962_v23  ;;  %v851_v30 = vrot.slane %v850_v18, 4  ;;  %v861_v31 = vrot.slane %v860_v19, 4  ;;  %v1121_v32 = vrot.slane %v2217_v17, 5  ;;  %v2577_v17 = vld [vmem:[%s2803_s10 + $0x48] sm:$0xff]  }
  0x4c   : > { %v1150_v34 = vsel %vm2805_vm2, %v1148_v25, %v1149_v20  ;;  %v1119_v35 = vsel %vm2805_vm2, %v2239_v21, %v1118_v26  ;;  %v1120_v36 = vrot.slane %v1118_v26, 4  ;;  %v2244_v37 = vrot.slane %v2230_v22, 9  ;;  %v2297_v22 = vld [vmem:[%s2803_s10 + $0x58] sm:$0xf] }
  0x4d   : > { %1045 = vrot.lane.b32.xlu1 %v2212_v29, %s2699_s24  ;;  %v856_v40 = vsel %vm2859_vm5, %v851_v30, %v855_v9  ;;  %v866_v41 = vsel %vm2859_vm5, %v861_v31, %v865_v15  ;;  %v2251_v42 = vcombine.low %v1147_v24, %v1150_v34  ;;  %v1153_v43 = vrot.slane %v2231_v27, 5  ;;  %v2578_v27 = vld [vmem:[%s2803_s10 + $0x18] sm:$0xff]  }
  0x4e   : > { %v2208_v46 = vcombine.low %v856_v40, %v866_v41  ;;  %v1122_v47 = vsel %vm2805_vm2, %v1120_v36, %v1121_v32  ;;  %v1156_v48 = vrot.slane %v2232_v28, 5  ;;  %v2240_v49 = vrot.slane %v2218_v33, 9 }
  0x4f   : > { %v2247_v50 = vcombine.low %v1119_v35, %v1122_v47  ;;  %v1154_v51 = vsel %vm2805_vm2, %v2244_v37, %v1153_v43  ;;  %v1155_v52 = vrot.slane %v1153_v43, 4  ;;  %v1125_v53 = vrot.slane %v2219_v38, 5  ;;  %v2298_v35 = vld [vmem:[%s2803_s10 + $0x5c] sm:$0x1]  ;;  %v2284_v37 = vld [vmem:[%s2803_s10 + $0x24] sm:$0xf] }
  0x50   : > { %1037 = vrot.lane.b32.xlu0 %v2208_v46, %s2699_s24  ;;  %v1128_v55 = vrot.slane %v2220_v39, 5  ;;  %v1443_v56 = vshrl.u32 %v2293_v44, 16  ;;  %v1446_v57 = vshll.u32 %v2293_v44, 16  ;;  %v1452_v58 = vshll.u32 %v2294_v45, 16  ;;  %v2579_v38 = vld [vmem:[%s2803_s10 + $0x54] sm:$0xff]  }
  0x51   : > { %1204 = vrot.lane.b32.xlu1 %v2251_v42, %s2700_s27  ;;  %v1157_v60 = vsel %vm2805_vm2, %v1155_v52, %v1156_v48  ;;  %v1126_v61 = vsel %vm2805_vm2, %v2240_v49, %v1125_v53  ;;  %v1127_v62 = vrot.slane %v1125_v53, 4  ;;  %v1456_v63 = vshrl.u32 %v2294_v45, 16  ;;  %v2285_v43 = vld [vmem:[%s2803_s10 + $0x28] sm:$0xf]  ;;  %v2286_v48 = vld [vmem:[%s2803_s10 + $0x2c] sm:$0x1] }
  0x52   : > { %v2252_v2 = vcombine.low %v1154_v51, %v1157_v60  ;;  %v1445_v3 = vrot.slane %v1443_v56, 4  ;;  %v1448_v4 = vrot.slane %v1446_v57, 5  ;;  %v1454_v5 = vrot.slane %v1452_v58, 5  ;;  %v2325_v53 = vld [vmem:[%s2803_s10 + $0x48] sm:$0xe] }
  0x53   : > { %v1129_v6 = vsel %vm2805_vm2, %v1127_v62, %v1128_v55  ;;  %v1458_v8 = vrot.slane %v1456_v63, 4  ;;  %v1462_v9 = vshll.u32 %v2295_v54, 16  ;;  %v1347_v11 = vshrl.u32 %v2281_v59, 16  ;;  %v2580_v54 = vld [vmem:[%s2803_s10 + $0x24] sm:$0xff]  }
  0x54   : > { %1196 = vrot.lane.b32.xlu0 %v2247_v50, %s2700_s27  ;;  %v2248_v12 = vcombine.low %v1126_v61, %v1129_v6  ;;  %v1449_v13 = vor.u32 %v1448_v4, %v1445_v3  ;;  %v1350_v14 = vshll.u32 %v2281_v59, 16  ;;  %v1356_v15 = vshll.u32 %v2282_v1, 16  ;;  %v2326_v59 = vld [vmem:[%s2803_s10 + $0x4c] sm:$0xf]  ;;  %v2313_v6 = vld [vmem:[%s2803_s10 + $0x18] sm:$0xe] }
  0x55   : > { %1206 = vrot.lane.b32.xlu1 %v2252_v2, %s2700_s27  ;;  %v1459_v18 = vor.u32 %v1458_v8, %v1454_v5  ;;  %v1464_v19 = vrot.slane %v1462_v9, 5  ;;  %v1349_v20 = vrot.slane %v1347_v11, 4  ;;  %v1360_v21 = vshrl.u32 %v2282_v1, 16  ;;  %v2327_v1 = vld [vmem:[%s2803_s10 + $0x50] sm:$0x1] }
  0x56   : > { %v1450_v23 = vrot.slane %v1449_v13, 4  ;;  %v1352_v24 = vrot.slane %v1350_v14, 5  ;;  %v1358_v25 = vrot.slane %v1356_v15, 5  ;;  %v1366_v26 = vshll.u32 %v2283_v10, 16  ;;  %v2314_v8 = vld [vmem:[%s2803_s10 + $0x1c] sm:$0xf] }
  0x57   : > { %v1460_v28 = vrot.slane %v1459_v18, 4  ;;  %v1362_v29 = vrot.slane %v1360_v21, 4  ;;  %v1467_v30 = vshrl.u32 %v2296_v16, 16  ;;  %v1470_v31 = vshll.u32 %v2296_v16, 16 }
  0x58   : > { %1198 = vrot.lane.b32.xlu0 %v2248_v12, %s2700_s27  ;;  %v1455_v32 = vsel %vm2859_vm5, %v1450_v23, %v1454_v5  ;;  %v1353_v33 = vor.u32 %v1352_v24, %v1349_v20  ;;  %v1368_v34 = vrot.slane %v1366_v26, 5  ;;  %v1476_v36 = vshll.u32 %v2297_v22, 16 }
  0x59   : > { %1297 = vrot.lane.b32.xlu1 %v2577_v17, %s2701_s28  ;;  %v1465_v39 = vsel %vm2859_vm5, %v1460_v28, %v1464_v19  ;;  %v1363_v40 = vor.u32 %v1362_v29, %v1358_v25  ;;  %v1469_v41 = vrot.slane %v1467_v30, 4  ;;  %v1472_v42 = vrot.slane %v1470_v31, 5  ;;  %v2315_v17 = vld [vmem:[%s2803_s10 + $0x20] sm:$0x1] }
  0x5a   : > { %v2309_v44 = vcombine.low %v1455_v32, %v1465_v39  ;;  %v1354_v45 = vrot.slane %v1353_v33, 4  ;;  %v1478_v46 = vrot.slane %v1476_v36, 5  ;;  %v1480_v47 = vshrl.u32 %v2297_v22, 16  ;;  %v280_v22 = vld [vmem:[%s2803_s10 + $0x48] sm:$0xf] }
  0x5b   : > { %v1364_v49 = vrot.slane %v1363_v40, 4  ;;  %v1473_v50 = vor.u32 %v1472_v42, %v1469_v41  ;;  %v1486_v51 = vshll.u32 %v2298_v35, 16  ;;  %v1371_v52 = vshrl.u32 %v2284_v37, 16  ;;  %v282_v32 = vld [vmem:[%s2803_s10 + $0x50] sm:$0x1] }
  0x5c   : > { %1289 = vrot.lane.b32.xlu0 %v2578_v27, %s2701_s28  ;;  %v1359_v55 = vsel %vm2859_vm5, %v1354_v45, %v1358_v25  ;;  %v1482_v56 = vrot.slane %v1480_v47, 4  ;;  %v1374_v57 = vshll.u32 %v2284_v37, 16  ;;  %v1380_v58 = vshll.u32 %v2285_v43, 16  ;;  %v281_v27 = vld [vmem:[%s2803_s10 + $0x4c] sm:$0xf] }
  0x5d   : > { %1299 = vrot.lane.b32.xlu1 %v2579_v38, %s2701_s28  ;;  %v1369_v60 = vsel %vm2859_vm5, %v1364_v49, %v1368_v34  ;;  %v1474_v61 = vrot.slane %v1473_v50, 4  ;;  %v1488_v62 = vrot.slane %v1486_v51, 5  ;;  %v1373_v63 = vrot.slane %v1371_v52, 4  ;;  %v268_v37 = vld [vmem:[%s2803_s10 + $0x18] sm:$0xf] }
  0x5e   : > { %v2305_v2 = vcombine.low %v1359_v55, %v1369_v60  ;;  %v1483_v3 = vor.u32 %v1482_v56, %v1478_v46  ;;  %v1376_v4 = vrot.slane %v1374_v57, 5  ;;  %v1382_v5 = vrot.slane %v1380_v58, 5  ;;  %v269_v38 = vld [vmem:[%s2803_s10 + $0x1c] sm:$0xf]  ;;  %v2595_v60 = vld [vmem:[%s3429_s1] sm:$0xff]  }
  0x5f   : > { %v1479_v9 = vsel %vm2859_vm5, %v1474_v61, %v1478_v46  ;;  %v1384_v10 = vshrl.u32 %v2285_v43, 16  ;;  %v1390_v11 = vshll.u32 %v2286_v48, 16  ;;  %v2341_v12 = vrot.slane %v2325_v53, 9  ;;  %v270_v43 = vld [vmem:[%s2803_s10 + $0x20] sm:$0x1]  ;;  %2462 = vmatprep.subr.bf16.mxu0 %v2595_v60  ;;  %2484 = vmatprep.subr.bf16.mxu1 %v2595_v60 }
  0x60   : > { %1291 = vrot.lane.b32.xlu0 %v2580_v54, %s2701_s28  ;;  %v1484_v13 = vrot.slane %v1483_v3, 4  ;;  %v1377_v14 = vor.u32 %v1376_v4, %v1373_v63  ;;  %v1673_v15 = vrot.slane %v2326_v59, 5  ;;  %v1676_v16 = vrot.slane %v2327_v1, 5  ;;  %v2328_v48 = vld [vmem:[%s2803_s10 + $0x54] sm:$0xe]  ;;  %2463 = vmatpush3.bf16.msra.mxu0 %v2595_v60 }
  0x61   : > { %1570 = vrot.lane.b32.xlu1 %v2309_v44, %s2702_s29  ;;  %v1386_v18 = vrot.slane %v1384_v10, 4  ;;  %v1392_v19 = vrot.slane %v1390_v11, 5  ;;  %v2337_v20 = vrot.slane %v2313_v6, 9  ;;  %v1645_v21 = vrot.slane %v2314_v8, 5  ;;  %v2329_v53 = vld [vmem:[%s2803_s10 + $0x58] sm:$0xf]  ;;  %2487 = vmatpush3.bf16.msra.mxu1 %v2595_v60 }
  0x62   : > { %v1489_v23 = vsel %vm2859_vm5, %v1484_v13, %v1488_v62  ;;  %v1378_v24 = vrot.slane %v1377_v14, 4  ;;  %v1674_v25 = vsel %vm2805_vm2, %v2341_v12, %v1673_v15  ;;  %v1675_v26 = vrot.slane %v1673_v15, 4  ;;  %v2330_v54 = vld [vmem:[%s2803_s10 + $0x5c] sm:$0x1]  ;;  %v2316_v59 = vld [vmem:[%s2803_s10 + $0x24] sm:$0xe] }
  0x63   : > { %v2310_v28 = vcombine.low %v1479_v9, %v1489_v23  ;;  %v1387_v29 = vor.u32 %v1386_v18, %v1382_v5  ;;  %v2996_v30 = vsel %vm2805_vm2, %v2337_v20, %v1645_v21  ;;  %v1647_v31 = vrot.slane %v1645_v21, 4  ;;  %v2318_v8 = vld [vmem:[%s2803_s10 + $0x2c] sm:$0x1]  ;;  %v283_v21 = vld [vmem:[%s2803_s10 + $0x54] sm:$0xf] }
  0x64   : > { %1562 = vrot.lane.b32.xlu0 %v2305_v2, %s2702_s29  ;;  %v1383_v33 = vsel %vm2859_vm5, %v1378_v24, %v1382_v5  ;;  %v1677_v34 = vsel %vm2805_vm2, %v1675_v26, %v1676_v16  ;;  %v1648_v35 = vrot.slane %v2315_v17, 5  ;;  %v434_v36 = vshrl.u32 %v280_v22, 16  ;;  %v2317_v2 = vld [vmem:[%s2803_s10 + $0x28] sm:$0xf] }
  0x65   : > { %1572 = vrot.lane.b32.xlu1 %v2310_v28, %s2702_s29  ;;  %v1388_v39 = vrot.slane %v1387_v29, 4  ;;  %v2349_v40 = vcombine.low %v1674_v25, %v1677_v34  ;;  %v437_v41 = vshll.u32 %v280_v22, 16  ;;  %v443_v42 = vshll.u32 %v281_v27, 16  ;;  %v2596_v22 = vld [vmem:[%s3429_s1 + $0x8] sm:$0xff]  }
  0x66   : > { %v1649_v44 = vsel %vm2805_vm2, %v1647_v31, %v1648_v35  ;;  %v436_v45 = vrot.slane %v434_v36, 4  ;;  %v447_v46 = vshrl.u32 %v281_v27, 16  ;;  %v453_v47 = vshll.u32 %v282_v32, 16  ;;  %v284_v31 = vld [vmem:[%s2803_s10 + $0x58] sm:$0xf]  ;;  %2464 = vmatprep.subr.bf16.mxu0 %v2596_v22  ;;  %2485 = vmatprep.subr.bf16.mxu1 %v2596_v22 }
  0x67   : > { %v1393_v49 = vsel %vm2859_vm5, %v1388_v39, %v1392_v19  ;;  %v2345_v50 = vcombine.low %v2996_v30, %v1649_v44  ;;  %v439_v51 = vrot.slane %v437_v41, 5  ;;  %v445_v52 = vrot.slane %v443_v42, 5  ;;  %v285_v35 = vld [vmem:[%s2803_s10 + $0x5c] sm:$0x1]  ;;  %2465 = vmatpush3.bf16.msra.mxu0 %v2596_v22  ;;  %2488 = vmatpush3.bf16.msra.mxu1 %v2596_v22  ;;  %v271_v41 = vld [vmem:[%s2803_s10 + $0x24] sm:$0xf] }
  0x68   : > { %v2306_v55 = vcombine.low %v1383_v33, %v1393_v49  ;;  %v449_v56 = vrot.slane %v447_v46, 4  ;;  %v455_v57 = vrot.slane %v453_v47, 5  ;;  %v338_v58 = vshrl.u32 %v268_v37, 16  ;;  %v272_v42 = vld [vmem:[%s2803_s10 + $0x28] sm:$0xf] }
  0x69   : > { %1731 = vrot.lane.b32.xlu1 %v2349_v40, %s2703_s6  ;;  %v440_v61 = vor.u32 %v439_v51, %v436_v45  ;;  %v341_v62 = vshll.u32 %v268_v37, 16  ;;  %v347_v63 = vshll.u32 %v269_v38, 16  ;;  %v351_v1 = vshrl.u32 %v269_v38, 16  ;;  %v273_v47 = vld [vmem:[%s2803_s10 + $0x2c] sm:$0x1] }
  0x6a   : > { %1564 = vrot.lane.b32.xlu0 %v2306_v55, %s2702_s29  ;;  %v450_v3 = vor.u32 %v449_v56, %v445_v52  ;;  %v340_v4 = vrot.slane %v338_v58, 4  ;;  %v357_v5 = vshll.u32 %v270_v43, 16  ;;  %v2342_v6 = vrot.slane %v2328_v48, 9  ;;  %v556_v48 = vld [vmem:[%s2803_s10 + $0x48] sm:$0xe] }
  0x6b   : > { %v441_v9 = vrot.slane %v440_v61, 4  ;;  %v343_v10 = vrot.slane %v341_v62, 5  ;;  %v349_v11 = vrot.slane %v347_v63, 5  ;;  %v353_v12 = vrot.slane %v351_v1, 4  ;;  %v558_v58 = vld [vmem:[%s2803_s10 + $0x50] sm:$0x1] }
  0x6c   : > { %v451_v13 = vrot.slane %v450_v3, 4  ;;  %v359_v14 = vrot.slane %v357_v5, 5  ;;  %v1680_v15 = vrot.slane %v2329_v53, 5  ;;  %v1683_v16 = vrot.slane %v2330_v54, 5  ;;  %v557_v53 = vld [vmem:[%s2803_s10 + $0x4c] sm:$0xf] }
  0x6d   : > { %v446_v17 = vsel %vm2859_vm5, %v441_v9, %v445_v52  ;;  %v344_v18 = vor.u32 %v343_v10, %v340_v4  ;;  %v354_v19 = vor.u32 %v353_v12, %v349_v11  ;;  %v2338_v20 = vrot.slane %v2316_v59, 9  ;;  %v544_v63 = vld [vmem:[%s2803_s10 + $0x18] sm:$0xe]  ;;  %v545_v5 = vld [vmem:[%s2803_s10 + $0x1c] sm:$0xf] }
  0x6e   : > { %1723 = vrot.lane.b32.xlu0 %v2345_v50, %s2703_s6  ;;  %v456_v23 = vsel %vm2859_vm5, %v451_v13, %v455_v57  ;;  %v1681_v24 = vsel %vm2805_vm2, %v2342_v6, %v1680_v15  ;;  %v1682_v25 = vrot.slane %v1680_v15, 4  ;;  %v1652_v26 = vrot.slane %v2317_v2, 5  ;;  %v561_v22 = vld [vmem:[%s2803_s10 + $0x5c] sm:$0x1] }
  0x6f   : > { %v2139_v27 = vcombine.low %v446_v17, %v456_v23  ;;  %v345_v28 = vrot.slane %v344_v18, 4  ;;  %v355_v29 = vrot.slane %v354_v19, 4  ;;  %v1655_v30 = vrot.slane %v2318_v8, 5 }
  0x70   : > { %v1684_v32 = vsel %vm2805_vm2, %v1682_v25, %v1683_v16  ;;  %v1653_v33 = vsel %vm2805_vm2, %v2338_v20, %v1652_v26  ;;  %v1654_v34 = vrot.slane %v1652_v26, 4  ;;  %v458_v36 = vshrl.u32 %v283_v21, 16  ;;  %v559_v16 = vld [vmem:[%s2803_s10 + $0x54] sm:$0xe] }
  0x71   : > { %517 = vrot.lane.b32.xlu1 %v2139_v27, %s2698_s21  ;;  %v350_v37 = vsel %vm2859_vm5, %v345_v28, %v349_v11  ;;  %v360_v38 = vsel %vm2859_vm5, %v355_v29, %v359_v14  ;;  %v2350_v39 = vcombine.low %v1681_v24, %v1684_v32  ;;  %v461_v40 = vshll.u32 %v283_v21, 16  ;;  %v546_v11 = vld [vmem:[%s2803_s10 + $0x20] sm:$0x1]  ;;  %v560_v21 = vld [vmem:[%s2803_s10 + $0x58] sm:$0xf] }
  0x72   : > { %v2135_v43 = vcombine.low %v350_v37, %v360_v38  ;;  %v1656_v44 = vsel %vm2805_vm2, %v1654_v34, %v1655_v30  ;;  %v460_v45 = vrot.slane %v458_v36, 4  ;;  %v467_v46 = vshll.u32 %v284_v31, 16  ;;  %v547_v27 = vld [vmem:[%s2803_s10 + $0x24] sm:$0xe]  ;;  %v548_v32 = vld [vmem:[%s2803_s10 + $0x28] sm:$0xf] }
  0x73   : > { %v2346_v49 = vcombine.low %v1653_v33, %v1656_v44  ;;  %v463_v50 = vrot.slane %v461_v40, 5  ;;  %v471_v51 = vshrl.u32 %v284_v31, 16  ;;  %v477_v52 = vshll.u32 %v285_v35, 16  ;;  %v549_v37 = vld [vmem:[%s2803_s10 + $0x2c] sm:$0x1] }
  0x74   : > { %509 = vrot.lane.b32.xlu0 %v2135_v43, %s2698_s21  ;;  %v469_v54 = vrot.slane %v467_v46, 5  ;;  %v362_v55 = vshrl.u32 %v271_v41, 16  ;;  %v365_v56 = vshll.u32 %v271_v41, 16  ;;  %v371_v57 = vshll.u32 %v272_v42, 16  ;;  %v2201_v38 = vld [vmem:[%s2803_s10 + $0x54] sm:$0xf] }
  0x75   : > { %1733 = vrot.lane.b32.xlu1 %v2350_v39, %s2703_s6  ;;  %v464_v59 = vor.u32 %v463_v50, %v460_v45  ;;  %v473_v60 = vrot.slane %v471_v51, 4  ;;  %v479_v61 = vrot.slane %v477_v52, 5  ;;  %v375_v62 = vshrl.u32 %v272_v42, 16  ;;  %v2202_v39 = vld [vmem:[%s2803_s10 + $0x58] sm:$0xf] }
  0x76   : > { %v364_v1 = vrot.slane %v362_v55, 4  ;;  %v367_v2 = vrot.slane %v365_v56, 5  ;;  %v373_v3 = vrot.slane %v371_v57, 5  ;;  %v381_v4 = vshll.u32 %v273_v47, 16  ;;  %v2203_v44 = vld [vmem:[%s2803_s10 + $0x5c] sm:$0x1] }
  0x77   : > { %v465_v6 = vrot.slane %v464_v59, 4  ;;  %v474_v8 = vor.u32 %v473_v60, %v469_v54  ;;  %v377_v9 = vrot.slane %v375_v62, 4  ;;  %v2147_v10 = vrot.slane %v556_v48, 9 }
  0x78   : > { %1725 = vrot.lane.b32.xlu0 %v2346_v49, %s2703_s6  ;;  %v368_v12 = vor.u32 %v367_v2, %v364_v1  ;;  %v383_v13 = vrot.slane %v381_v4, 5  ;;  %v633_v14 = vrot.slane %v557_v53, 5  ;;  %v636_v15 = vrot.slane %v558_v58, 5  ;;  %v2189_v53 = vld [vmem:[%s2803_s10 + $0x24] sm:$0xf] }
  0x79   : > { %v470_v17 = vsel %vm2859_vm5, %v465_v6, %v469_v54  ;;  %v475_v18 = vrot.slane %v474_v8, 4  ;;  %v378_v19 = vor.u32 %v377_v9, %v373_v3  ;;  %v2143_v20 = vrot.slane %v544_v63, 9  ;;  %v2190_v54 = vld [vmem:[%s2803_s10 + $0x28] sm:$0xf]  ;;  %v2191_v4 = vld [vmem:[%s2803_s10 + $0x2c] sm:$0x1] }
  0x7a   : > { %v369_v23 = vrot.slane %v368_v12, 4  ;;  %v634_v24 = vsel %vm2805_vm2, %v2147_v10, %v633_v14  ;;  %v635_v25 = vrot.slane %v633_v14, 4  ;;  %v605_v26 = vrot.slane %v545_v5, 5  ;;  %v2204_v10 = vld [vmem:[%s2803_s10 + $0x60] sm:$0xf] }
  0x7b   : > { %v480_v28 = vsel %vm2859_vm5, %v475_v18, %v479_v61  ;;  %v379_v29 = vrot.slane %v378_v19, 4  ;;  %v608_v30 = vrot.slane %v546_v11, 5  ;;  %v2148_v31 = vrot.slane %v559_v16, 9  ;;  %v2205_v19 = vld [vmem:[%s2803_s10 + $0x64] sm:$0xf] }
  0x7c   : > { %v2140_v33 = vcombine.low %v470_v17, %v480_v28  ;;  %v374_v34 = vsel %vm2859_vm5, %v369_v23, %v373_v3  ;;  %v637_v35 = vsel %vm2805_vm2, %v635_v25, %v636_v15  ;;  %v606_v36 = vsel %vm2805_vm2, %v2143_v20, %v605_v26  ;;  %v2581_v20 = vld [vmem:[%s2803_s10 + $0x54] sm:$0xff]  }
  0x7d   : > { %v384_v40 = vsel %vm2859_vm5, %v379_v29, %v383_v13  ;;  %v2155_v41 = vcombine.low %v634_v24, %v637_v35  ;;  %v607_v42 = vrot.slane %v605_v26, 4  ;;  %v640_v43 = vrot.slane %v560_v21, 5  ;;  %v2206_v29 = vld [vmem:[%s2803_s10 + $0x68] sm:$0x1]  ;;  %v2192_v35 = vld [vmem:[%s2803_s10 + $0x30] sm:$0xf] }
  0x7e   : > { %519 = vrot.lane.b32.xlu1 %v2140_v33, %s2698_s21  ;;  %v2136_v45 = vcombine.low %v374_v34, %v384_v40  ;;  %v643_v46 = vrot.slane %v561_v22, 5  ;;  %v2144_v47 = vrot.slane %v547_v27, 9  ;;  %v612_v48 = vrot.slane %v548_v32, 5  ;;  %v2193_v40 = vld [vmem:[%s2803_s10 + $0x34] sm:$0xf] }
  0x7f   : > { %v609_v49 = vsel %vm2805_vm2, %v607_v42, %v608_v30  ;;  %v641_v50 = vsel %vm2805_vm2, %v2148_v31, %v640_v43  ;;  %v642_v51 = vrot.slane %v640_v43, 4  ;;  %v615_v52 = vrot.slane %v549_v37, 5  ;;  %v2582_v30 = vld [vmem:[%s2803_s10 + $0x24] sm:$0xff]   ;;  %v2584_v42 = vld [vmem:[%s2803_s10 + $0x30] sm:$0xff]  }
  0x80   : > { %511 = vrot.lane.b32.xlu0 %v2136_v45, %s2698_s21  ;;  %v2151_v55 = vcombine.low %v606_v36, %v609_v49  ;;  %v613_v56 = vsel %vm2805_vm2, %v2144_v47, %v612_v48  ;;  %v614_v57 = vrot.slane %v612_v48, 4  ;;  %v964_v58 = vshrl.u32 %v2201_v38, 16 }
  0x81   : > { %v644_v59 = vsel %vm2805_vm2, %v642_v51, %v643_v46  ;;  %v967_v60 = vshll.u32 %v2201_v38, 16  ;;  %v973_v61 = vshll.u32 %v2202_v39, 16  ;;  %v977_v62 = vshrl.u32 %v2202_v39, 16 }
  0x82   : > { %681 = vrot.lane.b32.xlu1 %v2155_v41, %s2697_s20  ;;  %v2156_v63 = vcombine.low %v641_v50, %v644_v59  ;;  %v616_v1 = vsel %vm2805_vm2, %v614_v57, %v615_v52  ;;  %v966_v2 = vrot.slane %v964_v58, 4  ;;  %v983_v3 = vshll.u32 %v2203_v44, 16  ;;  %v2583_v41 = vld [vmem:[%s2803_s10 + $0x60] sm:$0xff]   ;;  %v2194_v50 = vld [vmem:[%s2803_s10 + $0x38] sm:$0x1] }
  0x83   : > { %v2152_v5 = vcombine.low %v613_v56, %v616_v1  ;;  %v969_v6 = vrot.slane %v967_v60, 5  ;;  %v975_v8 = vrot.slane %v973_v61, 5  ;;  %v979_v9 = vrot.slane %v977_v62, 4  ;;  %v2233_v56 = vld [vmem:[%s2803_s10 + $0x54] sm:$0xe] }
  0x84   : > { %673 = vrot.lane.b32.xlu0 %v2151_v55, %s2697_s20  ;;  %v985_v11 = vrot.slane %v983_v3, 5  ;;  %v868_v12 = vshrl.u32 %v2189_v53, 16  ;;  %v871_v13 = vshll.u32 %v2189_v53, 16  ;;  %v877_v14 = vshll.u32 %v2190_v54, 16  ;;  %v2234_v57 = vld [vmem:[%s2803_s10 + $0x58] sm:$0xf] }
  0x85   : > { %v970_v15 = vor.u32 %v969_v6, %v966_v2  ;;  %v980_v16 = vor.u32 %v979_v9, %v975_v8  ;;  %v881_v17 = vshrl.u32 %v2190_v54, 16  ;;  %v887_v18 = vshll.u32 %v2191_v4, 16  ;;  %v2235_v62 = vld [vmem:[%s2803_s10 + $0x5c] sm:$0x1]  ;;  %v2223_v6 = vld [vmem:[%s2803_s10 + $0x2c] sm:$0x1] }
  0x86   : > { %683 = vrot.lane.b32.xlu1 %v2156_v63, %s2697_s20  ;;  %v870_v21 = vrot.slane %v868_v12, 4  ;;  %v873_v22 = vrot.slane %v871_v13, 5  ;;  %v879_v23 = vrot.slane %v877_v14, 5  ;;  %v988_v24 = vshrl.u32 %v2204_v10, 16  ;;  %v2221_v63 = vld [vmem:[%s2803_s10 + $0x24] sm:$0xe] }
  0x87   : > { %v971_v25 = vrot.slane %v970_v15, 4  ;;  %v981_v26 = vrot.slane %v980_v16, 4  ;;  %v883_v27 = vrot.slane %v881_v17, 4  ;;  %v889_v28 = vrot.slane %v887_v18, 5  ;;  %v2236_v12 = vld [vmem:[%s2803_s10 + $0x60] sm:$0xe] }
  0x88   : > { %675 = vrot.lane.b32.xlu0 %v2152_v5, %s2697_s20  ;;  %v874_v31 = vor.u32 %v873_v22, %v870_v21  ;;  %v990_v32 = vrot.slane %v988_v24, 4  ;;  %v991_v33 = vshll.u32 %v2204_v10, 16  ;;  %v997_v34 = vshll.u32 %v2205_v19, 16  ;;  %v2222_v5 = vld [vmem:[%s2803_s10 + $0x28] sm:$0xf] }
  0x89   : > { %v976_v36 = vsel %vm2859_vm5, %v971_v25, %v975_v8  ;;  %v986_v37 = vsel %vm2859_vm5, %v981_v26, %v985_v11  ;;  %v884_v38 = vor.u32 %v883_v27, %v879_v23  ;;  %v1001_v39 = vshrl.u32 %v2205_v19, 16  ;;  %v2237_v17 = vld [vmem:[%s2803_s10 + $0x64] sm:$0xf]  ;;  %v2238_v18 = vld [vmem:[%s2803_s10 + $0x68] sm:$0x1] }
  0x8a   : > { %774 = vrot.lane.b32.xlu1 %v2581_v20, %s2696_s11  ;;  %v2213_v43 = vcombine.low %v976_v36, %v986_v37  ;;  %v875_v44 = vrot.slane %v874_v31, 4  ;;  %v993_v45 = vrot.slane %v991_v33, 5  ;;  %v999_v46 = vrot.slane %v997_v34, 5 }
  0x8b   : > { %v885_v47 = vrot.slane %v884_v38, 4  ;;  %v1003_v48 = vrot.slane %v1001_v39, 4  ;;  %v1007_v49 = vshll.u32 %v2206_v29, 16  ;;  %v892_v51 = vshrl.u32 %v2192_v35, 16  ;;  %v2225_v29 = vld [vmem:[%s2803_s10 + $0x34] sm:$0xf] }
  0x8c   : > { %766 = vrot.lane.b32.xlu0 %v2582_v30, %s2696_s11  ;;  %v880_v52 = vsel %vm2859_vm5, %v875_v44, %v879_v23  ;;  %v994_v53 = vor.u32 %v993_v45, %v990_v32  ;;  %v895_v54 = vshll.u32 %v2192_v35, 16  ;;  %v901_v55 = vshll.u32 %v2193_v40, 16  ;;  %v2224_v23 = vld [vmem:[%s2803_s10 + $0x30] sm:$0xe]  ;;  %v2226_v30 = vld [vmem:[%s2803_s10 + $0x38] sm:$0x1] }
  0x8d   : > { %v890_v58 = vsel %vm2859_vm5, %v885_v47, %v889_v28  ;;  %v1004_v59 = vor.u32 %v1003_v48, %v999_v46  ;;  %v1009_v60 = vrot.slane %v1007_v49, 5  ;;  %v894_v61 = vrot.slane %v892_v51, 4  ;;  %v2299_v35 = vld [vmem:[%s2803_s10 + $0x60] sm:$0xf]  ;;  %v2300_v44 = vld [vmem:[%s2803_s10 + $0x64] sm:$0xf] }
  0x8e   : > { %776 = vrot.lane.b32.xlu1 %v2583_v41, %s2696_s11  ;;  %v2209_v1 = vcombine.low %v880_v52, %v890_v58  ;;  %v995_v2 = vrot.slane %v994_v53, 4  ;;  %v897_v3 = vrot.slane %v895_v54, 5  ;;  %v903_v4 = vrot.slane %v901_v55, 5  ;;  %v2301_v45 = vld [vmem:[%s2803_s10 + $0x68] sm:$0x1] }
  0x8f   : > { %v1005_v8 = vrot.slane %v1004_v59, 4  ;;  %v905_v9 = vshrl.u32 %v2193_v40, 16  ;;  %v911_v10 = vshll.u32 %v2194_v50, 16  ;;  %v2245_v11 = vrot.slane %v2233_v56, 9  ;;  %v2288_v52 = vld [vmem:[%s2803_s10 + $0x34] sm:$0xf] }
  0x90   : > { %768 = vrot.lane.b32.xlu0 %v2584_v42, %s2696_s11  ;;  %v1000_v13 = vsel %vm2859_vm5, %v995_v2, %v999_v46  ;;  %v898_v14 = vor.u32 %v897_v3, %v894_v61  ;;  %v1160_v15 = vrot.slane %v2234_v57, 5  ;;  %v1163_v16 = vrot.slane %v2235_v62, 5  ;;  %v2287_v46 = vld [vmem:[%s2803_s10 + $0x30] sm:$0xf]  ;;  %v2289_v3 = vld [vmem:[%s2803_s10 + $0x38] sm:$0x1] }
  0x91   : > { %v1010_v19 = vsel %vm2859_vm5, %v1005_v8, %v1009_v60  ;;  %v907_v20 = vrot.slane %v905_v9, 4  ;;  %v913_v21 = vrot.slane %v911_v10, 5  ;;  %v2241_v22 = vrot.slane %v2221_v63, 9  ;;  %v3138_v24 = vpop.permute.xlu1 %770  ;;  %v3156_v47 = vpop.permute.xlu0 %762  ;;  %v2303_v10 = vld [vmem:[%s2803_s10 + $0x70] sm:$0xf]  ;;  %s2704_s11 = smov [#allocation3]  }
  0x92   : > { %1047 = vrot.lane.b32.xlu1 %v2213_v43, %s2699_s24  ;;  %v2214_v25 = vcombine.low %v1000_v13, %v1010_v19  ;;  %v899_v26 = vrot.slane %v898_v14, 4  ;;  %v1161_v27 = vsel %vm2805_vm2, %v2245_v11, %v1160_v15  ;;  %v1162_v28 = vrot.slane %v1160_v15, 4  ;;  %s2604_s20 = sshll.u32 %s2704_s11, 4  ;;  %s2605_s20 = int_to_ptr.vmem [resolvable:$false] %s2604_s20 }
  0x93   : > { %v908_v31 = vor.u32 %v907_v20, %v903_v4  ;;  %v1132_v32 = vrot.slane %v2222_v5, 5  ;;  %v1135_v33 = vrot.slane %v2223_v6, 5  ;;  %v2246_v34 = vrot.slane %v2236_v12, 9 }
  0x94   : > { %1039 = vrot.lane.b32.xlu0 %v2209_v1, %s2699_s24  ;;  %v904_v36 = vsel %vm2859_vm5, %v899_v26, %v903_v4  ;;  %v1164_v37 = vsel %vm2805_vm2, %v1162_v28, %v1163_v16  ;;  %v1167_v38 = vrot.slane %v2237_v17, 5  ;;  %v1170_v39 = vrot.slane %v2238_v18, 5  ;;  %v2302_v4 = vld [vmem:[%s2803_s10 + $0x6c] sm:$0xf]  ;;  %v2585_v26 = vld [vmem:[%s2803_s10 + $0x60] sm:$0xff]  }
  0x95   : > { %v909_v40 = vrot.slane %v908_v31, 4  ;;  %v2253_v41 = vcombine.low %v1161_v27, %v1164_v37  ;;  %v1133_v42 = vsel %vm2805_vm2, %v2241_v22, %v1132_v32  ;;  %v1134_v43 = vrot.slane %v1132_v32, 4  ;;  %v3166_v57 = vpop.permute.xlu1 %772  ;;  %v3179_v15 = vpop.permute.xlu0 %764 }
  0x96   : > { %1049 = vrot.lane.b32.xlu1 %v2214_v25, %s2699_s24  ;;  %v1168_v48 = vsel %vm2805_vm2, %v2246_v34, %v1167_v38  ;;  %v1169_v49 = vrot.slane %v1167_v38, 4  ;;  %v2242_v50 = vrot.slane %v2224_v23, 9  ;;  %v1139_v51 = vrot.slane %v2225_v29, 5 }
  0x97   : > { %v914_v53 = vsel %vm2859_vm5, %v909_v40, %v913_v21  ;;  %v1136_v54 = vsel %vm2805_vm2, %v1134_v43, %v1135_v33  ;;  %v1142_v55 = vrot.slane %v2226_v30, 5  ;;  %v1491_v56 = vshrl.u32 %v2299_v35, 16  ;;  %v2304_v33 = vld [vmem:[%s2803_s10 + $0x74] sm:$0x1]  ;;  %v2290_v40 = vld [vmem:[%s2803_s10 + $0x3c] sm:$0xf] }
  0x98   : > { %v2210_v58 = vcombine.low %v904_v36, %v914_v53  ;;  %v2249_v59 = vcombine.low %v1133_v42, %v1136_v54  ;;  %v1171_v60 = vsel %vm2805_vm2, %v1169_v49, %v1170_v39  ;;  %v1140_v61 = vsel %vm2805_vm2, %v2242_v50, %v1139_v51  ;;  %v2291_v53 = vld [vmem:[%s2803_s10 + $0x40] sm:$0xf] }
  0x99   : > { %v2254_v62 = vcombine.low %v1168_v48, %v1171_v60  ;;  %v1141_v63 = vrot.slane %v1139_v51, 4  ;;  %v1493_v1 = vrot.slane %v1491_v56, 4  ;;  %v1494_v2 = vshll.u32 %v2299_v35, 16  ;;  %v3181_v25 = vpop.permute.xlu1 %677  ;;  %v2587_v48 = vld [vmem:[%s2803_s10 + $0x6c] sm:$0xff]  }
  0x9a   : > { %1041 = vrot.lane.b32.xlu0 %v2210_v58, %s2699_s24  ;;  %1208 = vrot.lane.b32.xlu1 %v2253_v41, %s2700_s27  ;;  %v1500_v5 = vshll.u32 %v2300_v44, 16  ;;  %v1504_v6 = vshrl.u32 %v2300_v44, 16  ;;  %v1510_v8 = vshll.u32 %v2301_v45, 16  ;;  %v1395_v9 = vshrl.u32 %v2287_v46, 16  ;;  %v2586_v41 = vld [vmem:[%s2803_s10 + $0x30] sm:$0xff]   ;;  %s175_s24 = sand.u32 1, %s2670_s13  }
  0x9b   : > { %v1143_v11 = vsel %vm2805_vm2, %v1141_v63, %v1142_v55  ;;  %v1496_v12 = vrot.slane %v1494_v2, 5  ;;  %v1398_v13 = vshll.u32 %v2287_v46, 16  ;;  %v1404_v14 = vshll.u32 %v2288_v52, 16  ;;  %v3191_v46 = vpop.permute.xlu0 %669  ;;  %v2292_v58 = vld [vmem:[%s2803_s10 + $0x44] sm:$0x1]  ;;  %s3375_s9 = scalar_lea.sflag [#allocation4], %s175_s24 }
  0x9c   : > { %v2250_v16 = vcombine.low %v1140_v61, %v1143_v11  ;;  %v1502_v17 = vrot.slane %v1500_v5, 5  ;;  %v1506_v18 = vrot.slane %v1504_v6, 4  ;;  %v1512_v19 = vrot.slane %v1510_v8, 5  ;;  %v2588_v61 = vld [vmem:[%s2803_s10 + $0x3c] sm:$0xff]  }
  0x9d   : > { %v1497_v20 = vor.u32 %v1496_v12, %v1493_v1  ;;  %v1397_v21 = vrot.slane %v1395_v9, 4  ;;  %v1400_v22 = vrot.slane %v1398_v13, 5  ;;  %v1406_v23 = vrot.slane %v1404_v14, 5  ;;  %v3202_v60 = vpop.permute.xlu1 %679  ;;  %v2332_v9 = vld [vmem:[%s2803_s10 + $0x64] sm:$0xf] }
  0x9e   : > { %1200 = vrot.lane.b32.xlu0 %v2249_v59, %s2700_s27  ;;  %1210 = vrot.lane.b32.xlu1 %v2254_v62, %s2700_s27  ;;  %v1507_v27 = vor.u32 %v1506_v18, %v1502_v17  ;;  %v1408_v28 = vshrl.u32 %v2288_v52, 16  ;;  %v1414_v29 = vshll.u32 %v2289_v3, 16  ;;  %v1515_v30 = vshrl.u32 %v2302_v4, 16  ;;  %v2331_v3 = vld [vmem:[%s2803_s10 + $0x60] sm:$0xe] }
  0x9f   : > { %v1498_v31 = vrot.slane %v1497_v20, 4  ;;  %v1401_v32 = vor.u32 %v1400_v22, %v1397_v21  ;;  %v1518_v34 = vshll.u32 %v2302_v4, 16  ;;  %v1524_v35 = vshll.u32 %v2303_v10, 16  ;;  %v2333_v14 = vld [vmem:[%s2803_s10 + $0x68] sm:$0x1] }
  0xa0   : > { %v1508_v36 = vrot.slane %v1507_v27, 4  ;;  %v1410_v37 = vrot.slane %v1408_v28, 4  ;;  %v1416_v38 = vrot.slane %v1414_v29, 5  ;;  %v1517_v39 = vrot.slane %v1515_v30, 4  ;;  %v2320_v21 = vld [vmem:[%s2803_s10 + $0x34] sm:$0xf] }
  0xa1   : > { %v1503_v42 = vsel %vm2859_vm5, %v1498_v31, %v1502_v17  ;;  %v1402_v43 = vrot.slane %v1401_v32, 4  ;;  %v1520_v44 = vrot.slane %v1518_v34, 5  ;;  %v1526_v45 = vrot.slane %v1524_v35, 5  ;;  %v2321_v22 = vld [vmem:[%s2803_s10 + $0x38] sm:$0x1] }
  0xa2   : > { %1202 = vrot.lane.b32.xlu0 %v2250_v16, %s2700_s27  ;;  %1301 = vrot.lane.b32.xlu1 %v2585_v26, %s2701_s28  ;;  %v1513_v49 = vsel %vm2859_vm5, %v1508_v36, %v1512_v19  ;;  %v1411_v50 = vor.u32 %v1410_v37, %v1406_v23  ;;  %v1528_v51 = vshrl.u32 %v2303_v10, 16  ;;  %v1534_v52 = vshll.u32 %v2304_v33, 16  ;;  %v2319_v16 = vld [vmem:[%s2803_s10 + $0x30] sm:$0xe]  ;;  %v2334_v30 = vld [vmem:[%s2803_s10 + $0x6c] sm:$0xe] }
  0xa3   : > { %v2311_v54 = vcombine.low %v1503_v42, %v1513_v49  ;;  %v1407_v55 = vsel %vm2859_vm5, %v1402_v43, %v1406_v23  ;;  %v1521_v56 = vor.u32 %v1520_v44, %v1517_v39  ;;  %v1419_v59 = vshrl.u32 %v2290_v40, 16  ;;  %v3217_v23 = vpop.permute.xlu0 %671  ;;  %v2335_v35 = vld [vmem:[%s2803_s10 + $0x70] sm:$0xf]  ;;  %v2590_v49 = vld [vmem:[%s2803_s10] sm:$0xff]   ;;  %s2120_s27 = sshll.u32 %s175_s24, 6 }
  0xa4   : > { %v1412_v62 = vrot.slane %v1411_v50, 4  ;;  %v1530_v63 = vrot.slane %v1528_v51, 4  ;;  %v1536_v1 = vrot.slane %v1534_v52, 5  ;;  %v1422_v2 = vshll.u32 %v2290_v40, 16  ;;  %v2591_v50 = vld [vmem:[%s2803_s10 + $0x3c] sm:$0xff]   ;;  %v2592_v51 = vld [vmem:[%s2803_s10 + $0x30] sm:$0xff]  }
  0xa5   : > { %v1522_v4 = vrot.slane %v1521_v56, 4  ;;  %v1421_v5 = vrot.slane %v1419_v59, 4  ;;  %v1428_v6 = vshll.u32 %v2291_v53, 16  ;;  %v1432_v8 = vshrl.u32 %v2291_v53, 16  ;;  %v508_v36 = vpop.permute.xlu1 %507  ;;  %v2593_v52 = vld [vmem:[%s2803_s10 + $0x48] sm:$0xff]   ;;  %v2594_v53 = vld [vmem:[%s2803_s10 + $0x18] sm:$0xff]  }
  0xa6   : > { %1293 = vrot.lane.b32.xlu0 %v2586_v41, %s2701_s28  ;;  %1303 = vrot.lane.b32.xlu1 %v2587_v48, %s2701_s28  ;;  %v1417_v10 = vsel %vm2859_vm5, %v1412_v62, %v1416_v38  ;;  %v1531_v11 = vor.u32 %v1530_v63, %v1526_v45  ;;  %v1424_v12 = vrot.slane %v1422_v2, 5  ;;  %v1438_v13 = vshll.u32 %v2292_v58, 16  ;;  %v2336_v41 = vld [vmem:[%s2803_s10 + $0x74] sm:$0x1]  ;;  %v2589_v48 = vld [vmem:[%s2803_s10 + $0xc] sm:$0xff]   ;;  %254 = vst.msk [vmem:[#allocation2] sm:$0xff] %vm253_vm6, %v2590_v49 }
  0xa7   : > { %v2307_v17 = vcombine.low %v1407_v55, %v1417_v10  ;;  %v1527_v18 = vsel %vm2859_vm5, %v1522_v4, %v1526_v45  ;;  %v1430_v19 = vrot.slane %v1428_v6, 5  ;;  %v1434_v20 = vrot.slane %v1432_v8, 4  ;;  %v2322_v59 = vld [vmem:[%s2803_s10 + $0x3c] sm:$0xe]  ;;  %v2598_v6 = vld [vmem:[%s2803_s10 + $0x24] sm:$0xff]   ;;  %255 = vst.msk [vmem:[#allocation2 + $0x8] sm:$0xff] %vm253_vm6, %v2589_v48 }
  0xa8   : > { %v1532_v26 = vrot.slane %v1531_v11, 4  ;;  %v1425_v27 = vor.u32 %v1424_v12, %v1421_v5  ;;  %v1440_v28 = vrot.slane %v1438_v13, 5  ;;  %v2343_v29 = vrot.slane %v2331_v3, 9  ;;  %v2324_v3 = vld [vmem:[%s2803_s10 + $0x44] sm:$0x1]  ;;  %v2597_v5 = vld [vmem:[%s2803_s10 + $0x54] sm:$0xff]  }
  0xa9   : > { %v1435_v31 = vor.u32 %v1434_v20, %v1430_v19  ;;  %v1687_v32 = vrot.slane %v2332_v9, 5  ;;  %v1690_v33 = vrot.slane %v2333_v14, 5  ;;  %v2339_v34 = vrot.slane %v2319_v16, 9  ;;  %v506_v4 = vpop.permute.xlu0 %505  ;;  %259 = vst.msk [vmem:[#allocation2 + $0x28] sm:$0xff] %vm253_vm6, %v2591_v50  ;;  %258 = vst.msk [vmem:[#allocation2 + $0x20] sm:$0xff] %vm253_vm6, %v2592_v51 }
  0xaa   : > { %1295 = vrot.lane.b32.xlu0 %v2588_v61, %s2701_s28  ;;  %1574 = vrot.lane.b32.xlu1 %v2311_v54, %s2702_s29  ;;  %v1537_v37 = vsel %vm2859_vm5, %v1532_v26, %v1536_v1  ;;  %v1426_v38 = vrot.slane %v1425_v27, 4  ;;  %v1659_v39 = vrot.slane %v2320_v21, 5  ;;  %v1662_v40 = vrot.slane %v2321_v22, 5  ;;  %v2323_v61 = vld [vmem:[%s2803_s10 + $0x40] sm:$0xf]  ;;  %260 = vst.msk [vmem:[#allocation2 + $0x30] sm:$0xff] %vm253_vm6, %v2593_v52 }
  0xab   : > { %v2312_v42 = vcombine.low %v1527_v18, %v1537_v37  ;;  %v1436_v43 = vrot.slane %v1435_v31, 4  ;;  %v1688_v44 = vsel %vm2805_vm2, %v2343_v29, %v1687_v32  ;;  %v1689_v45 = vrot.slane %v1687_v32, 4  ;;  %256 = vst.msk [vmem:[#allocation2 + $0x10] sm:$0xff] %vm253_vm6, %v2594_v53  ;;  %261 = vst.msk [vmem:[#allocation2 + $0x38] sm:$0xff] %vm253_vm6, %v2597_v5  ;;  %s3353_s28 = scalar_lea.vmem [#allocation3], %s2120_s27  ;;  %s2606_s27 = scalar_lea.vmem %s2605_s20, 2048 }
  0xac   : > { %v1431_v54 = vsel %vm2859_vm5, %v1426_v38, %v1430_v19  ;;  %v1660_v55 = vsel %vm2805_vm2, %v2339_v34, %v1659_v39  ;;  %v1661_v56 = vrot.slane %v1659_v39, 4  ;;  %v2344_v58 = vrot.slane %v2334_v30, 9  ;;  %257 = vst.msk [vmem:[#allocation2 + $0x18] sm:$0xff] %vm253_vm6, %v2598_v6  ;;  %v2599_v19 = vld [vmem:[%s3429_s1 + $0x10] ss:$0 sps:$4 sm:$0x33]  }
  0xad   : > { %v1441_v62 = vsel %vm2859_vm5, %v1436_v43, %v1440_v28  ;;  %v1691_v63 = vsel %vm2805_vm2, %v1689_v45, %v1690_v33  ;;  %v1694_v1 = vrot.slane %v2335_v35, 5  ;;  %v1697_v2 = vrot.slane %v2336_v41, 5  ;;  %v516_v14 = vpop.permute.xlu1 %515  ;;  %531 = vst.msk [vmem:[#allocation2 + $0x8] sm:$0xff] %vm529_vm7, %v508_v36  ;;  %530 = vst.msk [vmem:[#allocation2] sm:$0xff] %vm529_vm7, %v506_v4  ;;  %2490 = vmatprep.subr.msk.bf16.mxu0 %vm1816_vm10, %v2599_v19  ;;  %s2029_s16 = sshll.u32 %s3353_s28, 4  ;;  %s3369_s16 = int_to_ptr.vmem [resolvable:$true] %s2029_s16 }
  0xae   : > { %1566 = vrot.lane.b32.xlu0 %v2307_v17, %s2702_s29  ;;  %1576 = vrot.lane.b32.xlu1 %v2312_v42, %s2702_s29  ;;  %v2308_v8 = vcombine.low %v1431_v54, %v1441_v62  ;;  %v2351_v9 = vcombine.low %v1688_v44, %v1691_v63  ;;  %v1663_v10 = vsel %vm2805_vm2, %v1661_v56, %v1662_v40  ;;  %v2340_v12 = vrot.slane %v2322_v59, 9  ;;  %s2600_s10 = scalar_lea.vmem %s3369_s16, 1024  ;;  %p2607_p2 = scmp.lt.s32.totalorder %s3369_s16, %s2605_s20 }
  0xaf   : > { %v1695_v7 = vsel %vm2805_vm2, %v2344_v58, %v1694_v1  ;;  %v1696_v11 = vrot.slane %v1694_v1, 4  ;;  %v1666_v13 = vrot.slane %v2323_v61, 5  ;;  %v1669_v16 = vrot.slane %v2324_v3, 5  ;;  %535 = vst.msk [vmem:[#allocation2 + $0x28] sm:$0xff] %vm529_vm7, %v516_v14  ;;  %2491 = vmatprep.subr.msk.bf16.mxu1 %vm1816_vm10, %v2599_v19  ;;  %p2601_p13 = scmp.ne.s32.totalorder %s3369_s16, %s2600_s10  ;;  %p2608_p4 = scmp.lt.s32.totalorder %s2606_s27, %s2600_s10 }
  0xb0   : > { %v2347_v20 = vcombine.low %v1660_v55, %v1663_v10  ;;  %695 = vst.msk [vmem:[#allocation2 + $0x8] sm:$0xff] %vm693_vm8, %v3217_v23  ;;  %694 = vst.msk [vmem:[#allocation2] sm:$0xff] %vm693_vm8, %v3191_v46  ;;  %v1818_v0 = vsel %vm1816_vm10, %v2599_v19, 0 }
  0xb1   : > { %v1698_v17 = vsel %vm2805_vm2, %v1696_v11, %v1697_v2  ;;  %v1668_v18 = vrot.slane %v1666_v13, 4  ;;  %v1667_v22 = vsel %vm2805_vm2, %v2340_v12, %v1666_v13  ;;  %699 = vst.msk [vmem:[#allocation2 + $0x28] sm:$0xff] %vm693_vm8, %v3202_v60  ;;  %2467 = vmatpush3.bf16.msra.mxu0 %v1818_v0  ;;  %2489 = vmatpush3.bf16.msra.mxu1 %v1818_v0  ;;  %p2602_p0 = pnand %p2601_p13, %p2777_p3  ;;  %p2609_p5 = por %p2608_p4, %p2607_p2 }
  0xb2   : > { %1568 = vrot.lane.b32.xlu0 %v2308_v8, %s2702_s29  ;;  %1735 = vrot.lane.b32.xlu1 %v2351_v9, %s2703_s6  ;;  %v2352_v21 = vcombine.low %v1695_v7, %v1698_v17  ;;  %787 = vst.msk [vmem:[#allocation2] sm:$0xff] %vm786_vm9, %v3156_v47  ;;  %788 = vst.msk [vmem:[#allocation2 + $0x8] sm:$0xff] %vm786_vm9, %v3179_v15  ;;  %s2382_s29 = sshll.u32 %s2678_s15, 4 }
  0xb3   : > { %v1670_v26 = vsel %vm2805_vm2, %v1668_v18, %v1669_v16  ;;  %v514_v27 = vpop.permute.xlu0 %513  ;;  %792 = vst.msk [vmem:[#allocation2 + $0x28] sm:$0xff] %vm786_vm9, %v3166_v57  ;;  %s2026_s5 = sadd.s32 %s2383_s4, %s2382_s29  ;;  %p2603_p1 = pneg %p2602_p0 }
  0xb4   : > { %534 = vst.msk [vmem:[#allocation2 + $0x20] sm:$0xff] %vm529_vm7, %v514_v27  ;;  %v2348_v46 = vcombine.low %v1667_v22, %v1670_v26  ;;  %v2353_v26 = vld [vmem:[%s3430_s2] ss:$0 sm:$0xff]  ;;  %s2384_s15 = sshll.u32 %s2026_s5, 6 }
  0xb5   : > { %698 = vst.msk [vmem:[#allocation2 + $0x20] sm:$0xff] %vm693_vm8, %v3181_v25  ;;  %s3367_s8 = scalar_lea.hbm %s3431_s3, %s2384_s15  ;;  %p2610_p6 = pnand %p2609_p5, %p2603_p1 }
  0xb6   : > { %1727 = vrot.lane.b32.xlu0 %v2347_v20, %s2703_s6  ;;  %1737 = vrot.lane.b32.xlu1 %v2352_v21, %s2703_s6  ;;  %791 = vst.msk [vmem:[#allocation2 + $0x20] sm:$0xff] %vm786_vm9, %v3138_v24 }
  0xb7   : > { %v1044_v47 = vpop.permute.xlu1 %1043 }
  0xb8   : > { %1064 = vst.msk [vmem:[#allocation2 + $0x20] sm:$0xff] %vm1059_vm11, %v1044_v47 }
  0xba   : > { %1729 = vrot.lane.b32.xlu0 %v2348_v46, %s2703_s6  ;;  %v1036_v57 = vpop.permute.xlu0 %1035 }
  0xbb   : > { %1060 = vst.msk [vmem:[#allocation2] sm:$0xff] %vm1059_vm11, %v1036_v57 }
  0xbf   : > { %v1046_v15 = vpop.permute.xlu1 %1045 }
  0xc0   : > { %1065 = vst.msk [vmem:[#allocation2 + $0x28] sm:$0xff] %vm1059_vm11, %v1046_v15 }
  0xc2   : > { %v1038_v25 = vpop.permute.xlu0 %1037 }
  0xc3   : > { %1061 = vst.msk [vmem:[#allocation2 + $0x8] sm:$0xff] %vm1059_vm11, %v1038_v25  ;;  %v1205_v60 = vpop.permute.xlu1 %1204 }
  0xc4   : > { %1225 = vst.msk [vmem:[#allocation2 + $0x20] sm:$0xff] %vm1220_vm12, %v1205_v60 }
  0xc6   : > { %v1197_v24 = vpop.permute.xlu0 %1196 }
  0xc7   : > { %1221 = vst.msk [vmem:[#allocation2] sm:$0xff] %vm1220_vm12, %v1197_v24  ;;  %v1207_v23 = vpop.permute.xlu1 %1206 }
  0xc8   : > { %1226 = vst.msk [vmem:[#allocation2 + $0x28] sm:$0xff] %vm1220_vm12, %v1207_v23 }
  0xca   : > { %v1199_v28 = vpop.permute.xlu0 %1198 }
  0xcb   : > { %1222 = vst.msk [vmem:[#allocation2 + $0x8] sm:$0xff] %vm1220_vm12, %v1199_v28  ;;  %v1298_v29 = vpop.permute.xlu1 %1297 }
  0xcc   : > { %1318 = vst.msk [vmem:[#allocation2 + $0x20] sm:$0xff] %vm1313_vm13, %v1298_v29 }
  0xce   : > { %v1290_v30 = vpop.permute.xlu0 %1289 }
  0xcf   : > { %1314 = vst.msk [vmem:[#allocation2] sm:$0xff] %vm1313_vm13, %v1290_v30  ;;  %v1300_v31 = vpop.permute.xlu1 %1299 }
  0xd0   : > { %1319 = vst.msk [vmem:[#allocation2 + $0x28] sm:$0xff] %vm1313_vm13, %v1300_v31 }
  0xd2   : > { %v1292_v32 = vpop.permute.xlu0 %1291 }
  0xd3   : > { %1315 = vst.msk [vmem:[#allocation2 + $0x8] sm:$0xff] %vm1313_vm13, %v1292_v32  ;;  %v1571_v33 = vpop.permute.xlu1 %1570 }
  0xd4   : > { %1591 = vst.msk [vmem:[#allocation2 + $0x20] sm:$0xff] %vm1586_vm14, %v1571_v33 }
  0xd6   : > { %v1563_v34 = vpop.permute.xlu0 %1562 }
  0xd7   : > { %1587 = vst.msk [vmem:[#allocation2] sm:$0xff] %vm1586_vm14, %v1563_v34  ;;  %v1573_v35 = vpop.permute.xlu1 %1572 }
  0xd8   : > { %1592 = vst.msk [vmem:[#allocation2 + $0x28] sm:$0xff] %vm1586_vm14, %v1573_v35 }
  0xdb   : > { %v1732_v36 = vpop.permute.xlu1 %1731 }
  0xdc   : > { %v1565_v37 = vpop.permute.xlu0 %1564  ;;  %1752 = vst.msk [vmem:[#allocation2 + $0x20] sm:$0xff] %vm1747_vm15, %v1732_v36 }
  0xdd   : > { %1588 = vst.msk [vmem:[#allocation2 + $0x8] sm:$0xff] %vm1586_vm14, %v1565_v37 }
  0xe0   : > { %v1724_v38 = vpop.permute.xlu0 %1723 }
  0xe1   : > { %1748 = vst.msk [vmem:[#allocation2] sm:$0xff] %vm1747_vm15, %v1724_v38 }
  0xe3   : > { %v518_v39 = vpop.permute.xlu1 %517  ;;  %v1760_v40 = vld [vmem:[#allocation2 + $0x20] sm:$0xff] }
  0xe4   : > { %536 = vst.msk [vmem:[#allocation2 + $0x30] sm:$0xff] %vm529_vm7, %v518_v39  ;;  %2476 = vmatprep.mubr.msk.bf16.mxu1 %vm1791_vm0, %v1760_v40 }
  0xe6   : > { %v510_v41 = vpop.permute.xlu0 %509 }
  0xe7   : > { %532 = vst.msk [vmem:[#allocation2 + $0x10] sm:$0xff] %vm529_vm7, %v510_v41  ;;  %v1734_v42 = vpop.permute.xlu1 %1733 }
  0xe8   : > { %1753 = vst.msk [vmem:[#allocation2 + $0x28] sm:$0xff] %vm1747_vm15, %v1734_v42  ;;  %v1756_v43 = vld [vmem:[#allocation2] sm:$0xff] }
  0xe9   : > { %2468 = vmatprep.mubr.msk.bf16.mxu0 %vm1791_vm0, %v1756_v43 }
  0xea   : > { %v1726_v44 = vpop.permute.xlu0 %1725 }
  0xeb   : > { %1749 = vst.msk [vmem:[#allocation2 + $0x8] sm:$0xff] %vm1747_vm15, %v1726_v44 }
  0xef   : > { %v1761_v45 = vld [vmem:[#allocation2 + $0x28] sm:$0xff] }
  0xf0   : > { %v520_v48 = vpop.permute.xlu1 %519  ;;  %2477 = vmatmul.mubr.msk.bf16.vlgmr.msra.gmra.mrb[0].mxu1 %vm1791_vm0, %v1761_v45 }
  0xf1   : > { %537 = vst.msk [vmem:[#allocation2 + $0x38] sm:$0xff] %vm529_vm7, %v520_v48 }
  0xf2   : > { %v512_v49 = vpop.permute.xlu0 %511  ;;  %v1757_v50 = vld [vmem:[#allocation2 + $0x8] sm:$0xff] }
  0xf3   : > { %533 = vst.msk [vmem:[#allocation2 + $0x18] sm:$0xff] %vm529_vm7, %v512_v49  ;;  %2469 = vmatmul.mubr.msk.bf16.vlgmr.msra.gmra.mrb[0].mxu0 %vm1791_vm0, %v1757_v50 }
  0xf4   : > { %v682_v51 = vpop.permute.xlu1 %681 }
  0xf5   : > { %700 = vst.msk [vmem:[#allocation2 + $0x30] sm:$0xff] %vm693_vm8, %v682_v51 }
  0xf6   : > { %v674_v52 = vpop.permute.xlu0 %673 }
  0xf7   : > { %696 = vst.msk [vmem:[#allocation2 + $0x10] sm:$0xff] %vm693_vm8, %v674_v52 }
  0xf8   : > { %v684_v53 = vpop.permute.xlu1 %683 }
  0xf9   : > { %701 = vst.msk [vmem:[#allocation2 + $0x38] sm:$0xff] %vm693_vm8, %v684_v53 }
  0xfa   : > { %v676_v54 = vpop.permute.xlu0 %675 }
  0xfb   : > { %697 = vst.msk [vmem:[#allocation2 + $0x18] sm:$0xff] %vm693_vm8, %v676_v54 }
  0xfc   : > { %v775_v55 = vpop.permute.xlu1 %774 }
  0xfd   : > { %793 = vst.msk [vmem:[#allocation2 + $0x30] sm:$0xff] %vm786_vm9, %v775_v55 }
  0xfe   : > { %v767_v56 = vpop.permute.xlu0 %766 }
  0xff   : > { %789 = vst.msk [vmem:[#allocation2 + $0x10] sm:$0xff] %vm786_vm9, %v767_v56 }
 0x100   : > { %v777_v58 = vpop.permute.xlu1 %776 }
 0x101   : > { %794 = vst.msk [vmem:[#allocation2 + $0x38] sm:$0xff] %vm786_vm9, %v777_v58 }
 0x102   : > { %v769_v59 = vpop.permute.xlu0 %768 }
 0x103   : > { %790 = vst.msk [vmem:[#allocation2 + $0x18] sm:$0xff] %vm786_vm9, %v769_v59 }
 0x104   : > { %v1048_v61 = vpop.permute.xlu1 %1047 }
 0x105   : > { %1066 = vst.msk [vmem:[#allocation2 + $0x30] sm:$0xff] %vm1059_vm11, %v1048_v61 }
 0x106   : > { %v1040_v62 = vpop.permute.xlu0 %1039 }
 0x107   : > { %1062 = vst.msk [vmem:[#allocation2 + $0x10] sm:$0xff] %vm1059_vm11, %v1040_v62 }
 0x108   : > { %v1050_v63 = vpop.permute.xlu1 %1049 }
 0x109   : > { %1067 = vst.msk [vmem:[#allocation2 + $0x38] sm:$0xff] %vm1059_vm11, %v1050_v63 }
 0x10c   : > { %v1042_v1 = vpop.permute.xlu0 %1041  ;;  %v1209_v2 = vpop.permute.xlu1 %1208 }
 0x10d   : > { %1063 = vst.msk [vmem:[#allocation2 + $0x18] sm:$0xff] %vm1059_vm11, %v1042_v1 }
 0x10e   : > { %1227 = vst.msk [vmem:[#allocation2 + $0x30] sm:$0xff] %vm1220_vm12, %v1209_v2 }
 0x110   : > { %v1201_v3 = vpop.permute.xlu0 %1200  ;;  %v1211_v4 = vpop.permute.xlu1 %1210 }
 0x111   : > { %1223 = vst.msk [vmem:[#allocation2 + $0x10] sm:$0xff] %vm1220_vm12, %v1201_v3  ;;  %1228 = vst.msk [vmem:[#allocation2 + $0x38] sm:$0xff] %vm1220_vm12, %v1211_v4 }
 0x114   : > { %v1203_v5 = vpop.permute.xlu0 %1202  ;;  %v1302_v6 = vpop.permute.xlu1 %1301 }
 0x115   : > { %1224 = vst.msk [vmem:[#allocation2 + $0x18] sm:$0xff] %vm1220_vm12, %v1203_v5 }
 0x116   : > { %1320 = vst.msk [vmem:[#allocation2 + $0x30] sm:$0xff] %vm1313_vm13, %v1302_v6 }
 0x118   : > { %v1294_v8 = vpop.permute.xlu0 %1293  ;;  %v1304_v9 = vpop.permute.xlu1 %1303 }
 0x119   : > { %1316 = vst.msk [vmem:[#allocation2 + $0x10] sm:$0xff] %vm1313_vm13, %v1294_v8  ;;  %1321 = vst.msk [vmem:[#allocation2 + $0x38] sm:$0xff] %vm1313_vm13, %v1304_v9 }
 0x11c   : > { %v1296_v10 = vpop.permute.xlu0 %1295  ;;  %v1575_v7 = vpop.permute.xlu1 %1574 }
 0x11d   : > { %1317 = vst.msk [vmem:[#allocation2 + $0x18] sm:$0xff] %vm1313_vm13, %v1296_v10 }
 0x11e   : > { %1593 = vst.msk [vmem:[#allocation2 + $0x30] sm:$0xff] %vm1586_vm14, %v1575_v7 }
 0x120   : > { %v1567_v11 = vpop.permute.xlu0 %1566  ;;  %v1577_v12 = vpop.permute.xlu1 %1576 }
 0x121   : > { %1589 = vst.msk [vmem:[#allocation2 + $0x10] sm:$0xff] %vm1586_vm14, %v1567_v11  ;;  %1594 = vst.msk [vmem:[#allocation2 + $0x38] sm:$0xff] %vm1586_vm14, %v1577_v12 }
 0x124   : > { %v1569_v13 = vpop.permute.xlu0 %1568  ;;  %v1736_v14 = vpop.permute.xlu1 %1735 }
 0x125   : > { %1590 = vst.msk [vmem:[#allocation2 + $0x18] sm:$0xff] %vm1586_vm14, %v1569_v13 }
 0x126   : > { %1754 = vst.msk [vmem:[#allocation2 + $0x30] sm:$0xff] %vm1747_vm15, %v1736_v14 }
 0x128   : > { %v1728_v16 = vpop.permute.xlu0 %1727  ;;  %v1738_v17 = vpop.permute.xlu1 %1737 }
 0x129   : > { %1750 = vst.msk [vmem:[#allocation2 + $0x10] sm:$0xff] %vm1747_vm15, %v1728_v16  ;;  %1755 = vst.msk [vmem:[#allocation2 + $0x38] sm:$0xff] %vm1747_vm15, %v1738_v17 }
 0x12c   : > { %v1730_v18 = vpop.permute.xlu0 %1729 }
 0x12d   : > { %v1762_v19 = vld [vmem:[#allocation2 + $0x30] sm:$0xff]  ;;  %1751 = vst.msk [vmem:[#allocation2 + $0x18] sm:$0xff] %vm1747_vm15, %v1730_v18 }
 0x12e   : > { %2480 = vmatprep.mubr.msk.bf16.mxu1 %vm1791_vm0, %v1762_v19 }
 0x130   : > { %v1758_v20 = vld [vmem:[#allocation2 + $0x10] sm:$0xff]  ;;  %v1763_v21 = vld [vmem:[#allocation2 + $0x38] sm:$0xff] }
 0x131   : > { %2472 = vmatprep.mubr.msk.bf16.mxu0 %vm1791_vm0, %v1758_v20  ;;  %2481 = vmatmul.mubr.msk.bf16.gmra.mrb[4].mxu1 %vm1791_vm0, %v1763_v21 }
 0x134   : > { %v1759_v22 = vld [vmem:[#allocation2 + $0x18] sm:$0xff] }
 0x135   : > { %2473 = vmatmul.mubr.msk.bf16.gmra.mrb[4].mxu0 %vm1791_vm0, %v1759_v22 }
 0x1c3   : > { %v2478_v27 = vpop.f32.mrb[0].mxu1 }
 0x1c4   : > { %v1895_v0 = vadd.f32 %v2478_v27, %v2353_v26  ;;  %v1886_v46 = vpop.f32.mrb[1].mxu1 }
 0x1c5   : > { %v1887_v47 = vadd.f32 %v2353_v26, %v1886_v46  ;;  %v2479_v57 = vpop.f32.mrb[2].mxu1 }
 0x1c6   : > { %v2470_v15 = vpop.f32.mrb[0].mxu0  ;;  %v1898_v25 = vadd.f32 %v2479_v57, %v2353_v26  ;;  %v1889_v60 = vpop.f32.mrb[3].mxu1  ;;  %v1927_v29 = vmax.f32 %v1895_v0, 0.0 }
 0x1c7   : > { %v1863_v24 = vadd.f32 %v2470_v15, %v2353_v26  ;;  %v1854_v23 = vpop.f32.mrb[1].mxu0  ;;  %v1890_v28 = vadd.f32 %v2353_v26, %v1889_v60  ;;  %v1925_v33 = vmax.f32 %v1887_v47, 0.0 }
 0x1c8   : > { %v1855_v30 = vadd.f32 %v2353_v26, %v1854_v23  ;;  %v2471_v31 = vpop.f32.mrb[2].mxu0  ;;  %v1928_v32 = vmax.f32 %v1898_v25, 0.0 }
 0x1c9   : > { %v1866_v34 = vadd.f32 %v2471_v31, %v2353_v26  ;;  %v1857_v35 = vpop.f32.mrb[3].mxu0  ;;  %v1926_v36 = vmax.f32 %v1890_v28, 0.0  ;;  %v1919_v39 = vmax.f32 %v1863_v24, 0.0 }
 0x1ca   : > { %v2432_v37 = vpack.c.bf16 %v1928_v32, %v1927_v29  ;;  %v1858_v38 = vadd.f32 %v2353_v26, %v1857_v35  ;;  %v1917_v42 = vmax.f32 %v1855_v30, 0.0 }
 0x1cb   : > { %v1920_v40 = vmax.f32 %v1866_v34, 0.0  ;;  %v2427_v41 = vpack.c.bf16 %v1926_v36, %v1925_v33 }
 0x1cc   : > { %2448 = vst [vmem:[%s3353_s28 + $0x28] sm:$0xff] %v2432_v37   ;;  %v1918_v43 = vmax.f32 %v1858_v38, 0.0 }
 0x1cd   : > { %v2412_v44 = vpack.c.bf16 %v1920_v40, %v1919_v39  ;;  %2447 = vst [vmem:[%s3353_s28 + $0x20] sm:$0xff] %v2427_v41  }
 0x1ce   : > { %v2407_v45 = vpack.c.bf16 %v1918_v43, %v1917_v42 }
 0x1cf   : > { %2444 = vst [vmem:[%s3353_s28 + $0x8] sm:$0xff] %v2412_v44  }
 0x1d0   : > { %2408 = vst [vmem:[%s3353_s28] sm:$0xff] %v2407_v45  }
 0x204   : > { %v2482_v48 = vpop.f32.mrb[4].mxu1 }
 0x205   : > { %v1911_v49 = vadd.f32 %v2482_v48, %v2353_v26  ;;  %v1902_v50 = vpop.f32.mrb[5].mxu1 }
 0x206   : > { %v1903_v51 = vadd.f32 %v2353_v26, %v1902_v50  ;;  %v2483_v52 = vpop.f32.mrb[6].mxu1 }
 0x207   : > { %v1914_v53 = vadd.f32 %v2483_v52, %v2353_v26  ;;  %v1905_v54 = vpop.f32.mrb[7].mxu1  ;;  %v1931_v59 = vmax.f32 %v1911_v49, 0.0 }
 0x208   : > { %v2474_v55 = vpop.f32.mrb[4].mxu0  ;;  %v1906_v56 = vadd.f32 %v2353_v26, %v1905_v54  ;;  %v1929_v1 = vmax.f32 %v1903_v51, 0.0 }
 0x209   : > { %v1879_v58 = vadd.f32 %v2474_v55, %v2353_v26  ;;  %v1870_v61 = vpop.f32.mrb[5].mxu0  ;;  %v1932_v62 = vmax.f32 %v1914_v53, 0.0 }
 0x20a   : > { %v1871_v63 = vadd.f32 %v2353_v26, %v1870_v61  ;;  %v2475_v2 = vpop.f32.mrb[6].mxu0  ;;  %v1930_v3 = vmax.f32 %v1906_v56, 0.0 }
 0x20b   : > { %v1882_v4 = vadd.f32 %v2475_v2, %v2353_v26  ;;  %v2442_v5 = vpack.c.bf16 %v1932_v62, %v1931_v59  ;;  %v1873_v6 = vpop.f32.mrb[7].mxu0  ;;  %v1923_v10 = vmax.f32 %v1879_v58, 0.0 }
 0x20c   : > { %v1874_v8 = vadd.f32 %v2353_v26, %v1873_v6  ;;  %v2437_v9 = vpack.c.bf16 %v1930_v3, %v1929_v1  ;;  %v1921_v11 = vmax.f32 %v1871_v63, 0.0 }
 0x20d   : > { %v1924_v7 = vmax.f32 %v1882_v4, 0.0  ;;  %2450 = vst [vmem:[%s3353_s28 + $0x38] sm:$0xff] %v2442_v5  }
 0x20e   : > { %v1922_v12 = vmax.f32 %v1874_v8, 0.0  ;;  %2449 = vst [vmem:[%s3353_s28 + $0x30] sm:$0xff] %v2437_v9  }
 0x20f   : > { %v2422_v13 = vpack.c.bf16 %v1924_v7, %v1923_v10 }
 0x210   : > { %v2417_v14 = vpack.c.bf16 %v1922_v12, %v1921_v11 }
 0x211   : > { %2446 = vst [vmem:[%s3353_s28 + $0x18] sm:$0xff] %v2422_v13  }
 0x212   : > { %2445 = vst [vmem:[%s3353_s28 + $0x10] sm:$0xff] %v2417_v14  }
 0x213   : > { %2613 = shalt.err (!%p2610_p6)
}
 0x214   : > { %s2614_s24 = scalar_lea.hbm %s3367_s8, 1024  ;;  %s2618_s4 = scalar_lea.hbm %s3431_s3, 4096 }
 0x215   : > { %p2615_p7 = scmp.ne.s32.totalorder %s3367_s8, %s2614_s24  ;;  %p2619_p11 = scmp.lt.u32.totalorder %s3367_s8, %s3431_s3 }
 0x216   : > { %p2620_p12 = scmp.lt.u32.totalorder %s2618_s4, %s2614_s24  ;;  %p2622_p0 = scmp.lt.u32.totalorder %s2614_s24, %s3367_s8 }
 0x217   : > { %p2616_p9 = pnand %p2615_p7, %p2777_p3 }
 0x218   : > { %p2621_p13 = por %p2620_p12, %p2619_p11 }
 0x219   : > { %p2617_p10 = pneg %p2616_p9 }
 0x21a   : > { %p2623_p1 = por %p2622_p0, %p2621_p13 }
 0x21c   : > { %p2624_p2 = pnand %p2623_p1, %p2617_p10 }
 0x21e   : > { %2627 = shalt.err (!%p2624_p2)
}
 0x21f   : > { %s2705_s6 = smov 64  }
 0x220   : > { %2493 = dma.vmem_to_hbm [thread:$0]  (%p2777_p3), %s3369_s16, 1024, %s3367_s8, %s3375_s9, %s2705_s6, %s2705_s6, %s2698_s21  }
 0x221 PF: > { %p2499_p4 = scmp.ge.s32.totalorder %s2694_s19, 2  ;;  %s2044_s7 = sand.u32 1, %s2666_s12  }
 0x222   : > { %s2045_s10 = scalar_lea.sflag [#allocation4], %s2044_s7 }
 0x223   : > { %p2496_p5 = pnand %p2499_p4, %p2786_p8 }
 0x225   : > { %2661 = dma.done.wait (!%p2496_p5), %s2045_s10, 1024  }
 0x226   : > { %2663 = vsyncadd (!%p2496_p5), %s2045_s10, 4294966272  ;;  %s16_s19 = sadd.s32 1, %s2694_s19   ;;  %s3438_s12 = smov %s2670_s13 }
 0x227   : > { %p13_p6 = scmp.ge.s32.totalorder %s16_s19, 6   ;;  %s3439_s13 = smov %s2674_s14 }
 0x228   : > { %s3440_s14 = smov %s2795_s30  ;;  %s3441_s15 = smov %s2686_s17 }
 0x229   : > { %s3442_s16 = smov %s2690_s18  ;;  %s3443_s17 = smov %s3446_s22 }
 0x22a   : > { %s3444_s18 = smov %s3450_s23  ;;  %15 = sbr.rel (!%p13_p6) target bundleno = 5 (0x5), region = 70 }
 0x231   :  { %2050 = vsyncpa [#allocation4], 1 }
 0x232   :  { %2052 = vsyncpa [#allocation4 + $0x1], 1 }

</bundles_post_ra>
